<compile_context>
chip_gen: v7x
topology: tpu7x:2x2x1
jax: 0.10.0
libtpu: 0.0.40
codegen_flags: <defaults>
</compile_context>

<pallas_src>
import math
import jax
import jax.numpy as jnp
from jax.experimental import pallas as pl
from jax.experimental.pallas import tpu as pltpu

N_FEATURES = 4
HIDDEN = 128
N_ACTIONS = 2
HEAD_SUBLANES = 8   # packed head rows: 0,1 = action probs, 2 = value, 3-7 = zero


def policy_kernel(x_ref, w1t_ref, b1t_ref, wht_ref, bht_ref, out_ref):
    """One batch tile, fully transposed (batch on lanes).

       h_T   = relu(W1^T @ x_T + b1^T)      (128, TB)  -- K=4 unrolled on the VPU
       out_T = W_head^T @ h_T + b_head^T    (8,  TB)   -- one lane-dense MXU matmul
       rows 0-1 <- 2-class softmax of the action logits (max-shifted, exact divide)
       row  2   <- state value, rows 3-7 stay zero
    """
    x = x_ref[...]                                    # (4, TB)   feature-major
    w1t = w1t_ref[...]                                # (128, 4)

    # Linear(4 -> 128), transposed: K=4 is far too shallow for the MXU; do 4
    # broadcast multiply-adds on the VPU (sublane-broadcast x rows,
    # lane-broadcast weight columns).
    h = w1t[:, 0:1] * x[0:1, :]
    for k in range(1, N_FEATURES):
        h = h + w1t[:, k:k + 1] * x[k:k + 1, :]
    h = jnp.maximum(h + b1t_ref[...], 0.0)            # (128, TB)

    # Fused action + value heads packed into 8 sublanes: single MXU matmul.
    out = jnp.dot(wht_ref[...], h, preferred_element_type=jnp.float32)
    out = out + bht_ref[...]                          # (8, TB)

    # Stable 2-class softmax on rows 0/1 (elementwise, no cross-lane reduce,
    # preserves relative precision of the small probability).
    l0 = out[0:1, :]
    l1 = out[1:2, :]
    m = jnp.maximum(l0, l1)
    e0 = jnp.exp(l0 - m)
    e1 = jnp.exp(l1 - m)
    inv = 1.0 / (e0 + e1)

    out_ref[...] = out.astype(out_ref.dtype)          # row 2 = value, rows 3-7 = 0
    out_ref[0:1, :] = (e0 * inv).astype(out_ref.dtype)
    out_ref[1:2, :] = (e1 * inv).astype(out_ref.dtype)


def init_params(key):
    """nn.Linear default init: U(-1/sqrt(fan_in), 1/sqrt(fan_in)).
    Weights returned pre-transposed as [in, out]."""
    def linear(key, fan_in, fan_out):
        kw, kb = jax.random.split(key)
        bound = 1.0 / math.sqrt(fan_in)
        w = jax.random.uniform(kw, (fan_in, fan_out), jnp.float32, -bound, bound)
        b = jax.random.uniform(kb, (1, fan_out), jnp.float32, -bound, bound)
        return w, b

    k1, k2, k3 = jax.random.split(key, 3)
    w1, b1 = linear(k1, N_FEATURES, HIDDEN)   # affine
    w2, b2 = linear(k2, HIDDEN, N_ACTIONS)    # action_head
    w3, b3 = linear(k3, HIDDEN, 1)            # value_head
    return w1, b1, w2, b2, w3, b3


def prepare_params(params):
    """Pack parameters into the kernel's transposed layout:
       w1t (128, 4), b1t (128, 1), wht (8, 128), bht (8, 1)."""
    w1, b1, w2, b2, w3, b3 = params
    w1t = w1.T                                           # (128, 4)
    b1t = b1.T                                           # (128, 1)
    wht = jnp.zeros((HEAD_SUBLANES, HIDDEN), jnp.float32)
    wht = wht.at[0:N_ACTIONS, :].set(w2.T)
    wht = wht.at[N_ACTIONS:N_ACTIONS + 1, :].set(w3.T)
    bht = jnp.zeros((HEAD_SUBLANES, 1), jnp.float32)
    bht = bht.at[0:N_ACTIONS, 0].set(b2[0])
    bht = bht.at[N_ACTIONS, 0].set(b3[0, 0])
    return w1t, b1t, wht, bht


def _forward_jax(x, fused_params):
    """Fused pure-JAX path for tiny batches (the RL select_action path)."""
    w1t, b1t, wht, bht = fused_params
    h = jnp.maximum(x @ w1t.T + b1t.T, 0.0)              # (B, 128)
    out = h @ wht.T + bht.T                              # (B, 8)
    probs = jax.nn.softmax(out[:, 0:N_ACTIONS], axis=-1)
    values = out[:, N_ACTIONS:N_ACTIONS + 1]
    return probs, values


def policy_forward(x, fused_params, *, block_b=2048, min_pallas_batch=256):
    """Returns (action_probs (B, 2), state_values (B, 1))."""
    B = x.shape[0]

    # Tiny batches are pure launch/DMA-priming overhead for a Pallas kernel;
    # a single fused XLA matmul chain is strictly cheaper there.
    if B < min_pallas_batch:
        return _forward_jax(x, fused_params)

    w1t, b1t, wht, bht = fused_params

    # Batch tile: large (default 2048) to amortize the ~0.35 us per-step
    # pipeline overhead, but always split into >=2 grid steps so both
    # TensorCores get work on megacore parts (harmless on 1-TC chips).
    # TB is a multiple of 128 so every block stays lane-dense.
    TB = block_b
    if -(-B // TB) < 2:
        half = -(-B // 2)
        TB = max(128, -(-half // 128) * 128)
    B_pad = -(-B // TB) * TB

    x_t = x.T                                            # (4, B)  feature-major
    if B_pad != B:
        x_t = jnp.pad(x_t, ((0, 0), (0, B_pad - B)))

    out = pl.pallas_call(
        policy_kernel,
        out_shape=jax.ShapeDtypeStruct((HEAD_SUBLANES, B_pad), jnp.float32),
        grid=(B_pad // TB,),
        in_specs=[
            pl.BlockSpec((N_FEATURES, TB), lambda i: (0, i)),         # x_T tile
            pl.BlockSpec((HIDDEN, N_FEATURES), lambda i: (0, 0)),     # W1^T (resident)
            pl.BlockSpec((HIDDEN, 1), lambda i: (0, 0)),              # b1^T (resident)
            pl.BlockSpec((HEAD_SUBLANES, HIDDEN), lambda i: (0, 0)),  # packed W_head^T
            pl.BlockSpec((HEAD_SUBLANES, 1), lambda i: (0, 0)),       # packed b_head^T
        ],
        out_specs=pl.BlockSpec((HEAD_SUBLANES, TB), lambda i: (0, i)),
        compiler_params=pltpu.CompilerParams(
            dimension_semantics=("parallel",)),
    )(x_t, w1t, b1t, wht, bht)

    probs = out[0:N_ACTIONS, :B].T                       # (B, 2)
    values = out[N_ACTIONS:N_ACTIONS + 1, :B].T          # (B, 1)
    return probs, values


def _reference(x, params):
    w1, b1, w2, b2, w3, b3 = params
    h = jnp.maximum(x @ w1 + b1, 0.0)
    return jax.nn.softmax(h @ w2 + b2, axis=-1), h @ w3 + b3


if __name__ == "__main__":
    key = jax.random.PRNGKey(0)
    kp, kx1, kx2, kx3 = jax.random.split(key, 4)

    params = init_params(kp)
    fused = prepare_params(params)

    def check(x):
        probs, values = policy_forward(x, fused)
        jax.block_until_ready((probs, values))
        probs_ref, values_ref = _reference(x, params)
        B = x.shape[0]
        assert probs.shape == (B, N_ACTIONS) and values.shape == (B, 1)
        assert jnp.allclose(probs, probs_ref, atol=1e-5, rtol=1e-5)
        assert jnp.allclose(values, values_ref, atol=1e-5, rtol=1e-5)
        assert jnp.allclose(jnp.sum(probs, axis=-1), 1.0, atol=1e-5)

    # Tiny CartPole-style batch (select_action path): fused pure-JAX fast path.
    check(jax.random.normal(kx1, (8, N_FEATURES), jnp.float32))

    # Update-step sized batch: Pallas path, 2 parallel grid steps (TB = 512).
    check(jax.random.normal(kx2, (1024, N_FEATURES), jnp.float32))

    # Odd batch size: exercises batch padding + packed transposed output layout.
    check(jax.random.normal(kx3, (300, N_FEATURES), jnp.float32))

    # TODO(synk): select_action (Categorical sampling + saved_actions bookkeeping)
    # is host-side RL plumbing, not part of the forward pass kernel.
    print("KERNEL_OK")
</pallas_src>

<mosaic_0001>
module attributes {stable_mosaic.version = 11 : i64} {
  func.func @policy_kernel(%arg0: i32, %arg1: memref<4x512xf32, #tpu.memory_space<vmem>>, %arg2: memref<128x4xf32, #tpu.memory_space<vmem>>, %arg3: memref<128x1xf32, #tpu.memory_space<vmem>>, %arg4: memref<8x128xf32, #tpu.memory_space<vmem>>, %arg5: memref<8x1xf32, #tpu.memory_space<vmem>>, %arg6: memref<8x512xf32, #tpu.memory_space<vmem>>) attributes {dimension_semantics = [#tpu.dimension_semantics<parallel>], iteration_bounds = array<i64: 2>, scalar_prefetch = 0 : i64, scratch_operands = 0 : i64, tpu.core_type = #tpu.core_type<tc>, window_params = [{transform_indices = @transform_0, window_bounds = array<i64: 4, 512>}, {pipeline_mode = #tpu.pipeline_mode<synchronous>, transform_indices = @transform_1, window_bounds = array<i64: 128, 4>}, {pipeline_mode = #tpu.pipeline_mode<synchronous>, transform_indices = @transform_2, window_bounds = array<i64: 128, 1>}, {pipeline_mode = #tpu.pipeline_mode<synchronous>, transform_indices = @transform_3, window_bounds = array<i64: 8, 128>}, {pipeline_mode = #tpu.pipeline_mode<synchronous>, transform_indices = @transform_4, window_bounds = array<i64: 8, 1>}, {transform_indices = @transform_5, window_bounds = array<i64: 8, 512>}]} {
    %c0 = arith.constant 0 : index
    %c0_0 = arith.constant 0 : index
    %0 = vector.load %arg1[%c0, %c0_0] : memref<4x512xf32, #tpu.memory_space<vmem>>, vector<4x512xf32>
    %c0_1 = arith.constant 0 : index
    %c0_2 = arith.constant 0 : index
    %1 = vector.load %arg2[%c0_1, %c0_2] : memref<128x4xf32, #tpu.memory_space<vmem>>, vector<128x4xf32>
    %2 = vector.extract_strided_slice %1 {offsets = [0, 0], sizes = [128, 1], strides = [1, 1]} : vector<128x4xf32> to vector<128x1xf32>
    %3 = vector.extract_strided_slice %0 {offsets = [0, 0], sizes = [1, 512], strides = [1, 1]} : vector<4x512xf32> to vector<1x512xf32>
    %4 = vector.broadcast %2 : vector<128x1xf32> to vector<128x512xf32>
    %5 = vector.broadcast %3 : vector<1x512xf32> to vector<128x512xf32>
    %6 = arith.mulf %4, %5 : vector<128x512xf32>
    %7 = vector.extract_strided_slice %1 {offsets = [0, 1], sizes = [128, 1], strides = [1, 1]} : vector<128x4xf32> to vector<128x1xf32>
    %8 = vector.extract_strided_slice %0 {offsets = [1, 0], sizes = [1, 512], strides = [1, 1]} : vector<4x512xf32> to vector<1x512xf32>
    %9 = vector.broadcast %7 : vector<128x1xf32> to vector<128x512xf32>
    %10 = vector.broadcast %8 : vector<1x512xf32> to vector<128x512xf32>
    %11 = arith.mulf %9, %10 : vector<128x512xf32>
    %12 = arith.addf %6, %11 : vector<128x512xf32>
    %13 = vector.extract_strided_slice %1 {offsets = [0, 2], sizes = [128, 1], strides = [1, 1]} : vector<128x4xf32> to vector<128x1xf32>
    %14 = vector.extract_strided_slice %0 {offsets = [2, 0], sizes = [1, 512], strides = [1, 1]} : vector<4x512xf32> to vector<1x512xf32>
    %15 = vector.broadcast %13 : vector<128x1xf32> to vector<128x512xf32>
    %16 = vector.broadcast %14 : vector<1x512xf32> to vector<128x512xf32>
    %17 = arith.mulf %15, %16 : vector<128x512xf32>
    %18 = arith.addf %12, %17 : vector<128x512xf32>
    %19 = vector.extract_strided_slice %1 {offsets = [0, 3], sizes = [128, 1], strides = [1, 1]} : vector<128x4xf32> to vector<128x1xf32>
    %20 = vector.extract_strided_slice %0 {offsets = [3, 0], sizes = [1, 512], strides = [1, 1]} : vector<4x512xf32> to vector<1x512xf32>
    %21 = vector.broadcast %19 : vector<128x1xf32> to vector<128x512xf32>
    %22 = vector.broadcast %20 : vector<1x512xf32> to vector<128x512xf32>
    %23 = arith.mulf %21, %22 : vector<128x512xf32>
    %24 = arith.addf %18, %23 : vector<128x512xf32>
    %c0_3 = arith.constant 0 : index
    %c0_4 = arith.constant 0 : index
    %25 = vector.load %arg3[%c0_3, %c0_4] : memref<128x1xf32, #tpu.memory_space<vmem>>, vector<128x1xf32>
    %26 = vector.broadcast %25 : vector<128x1xf32> to vector<128x512xf32>
    %27 = arith.addf %24, %26 : vector<128x512xf32>
    %cst = arith.constant 0.000000e+00 : f32
    %28 = vector.broadcast %cst : f32 to vector<128x512xf32>
    %29 = arith.maximumf %27, %28 : vector<128x512xf32>
    %c0_5 = arith.constant 0 : index
    %c0_6 = arith.constant 0 : index
    %30 = vector.load %arg4[%c0_5, %c0_6] : memref<8x128xf32, #tpu.memory_space<vmem>>, vector<8x128xf32>
    %cst_7 = arith.constant dense<0.000000e+00> : vector<8x512xf32>
    %31 = tpu.matmul %30, %29, %cst_7 {dimension_numbers = #tpu.dot_dimension_numbers<[1], [0], [0], [1], [0, 0, 1, 1], [], []>} : vector<8x128xf32>, vector<128x512xf32>, vector<8x512xf32> -> vector<8x512xf32>
    %c0_8 = arith.constant 0 : index
    %c0_9 = arith.constant 0 : index
    %32 = vector.load %arg5[%c0_8, %c0_9] : memref<8x1xf32, #tpu.memory_space<vmem>>, vector<8x1xf32>
    %33 = vector.broadcast %32 : vector<8x1xf32> to vector<8x512xf32>
    %34 = arith.addf %31, %33 : vector<8x512xf32>
    %35 = vector.extract_strided_slice %34 {offsets = [0, 0], sizes = [1, 512], strides = [1, 1]} : vector<8x512xf32> to vector<1x512xf32>
    %36 = vector.extract_strided_slice %34 {offsets = [1, 0], sizes = [1, 512], strides = [1, 1]} : vector<8x512xf32> to vector<1x512xf32>
    %37 = arith.maximumf %35, %36 : vector<1x512xf32>
    %38 = arith.subf %35, %37 : vector<1x512xf32>
    %39 = math.exp %38 : vector<1x512xf32>
    %40 = arith.subf %36, %37 : vector<1x512xf32>
    %41 = math.exp %40 : vector<1x512xf32>
    %42 = arith.addf %39, %41 : vector<1x512xf32>
    %cst_10 = arith.constant 1.000000e+00 : f32
    %43 = vector.broadcast %cst_10 : f32 to vector<1x512xf32>
    %44 = arith.divf %43, %42 : vector<1x512xf32>
    %c0_11 = arith.constant 0 : index
    %c0_12 = arith.constant 0 : index
    %45 = vector.load %arg6[%c0_11, %c0_12] : memref<8x512xf32, #tpu.memory_space<vmem>>, vector<8x512xf32>
    tpu.vector_store %arg6[%c0_11, %c0_12], %34 {strides = array<i32>} : memref<8x512xf32, #tpu.memory_space<vmem>>, vector<8x512xf32>,
    %46 = arith.mulf %39, %44 : vector<1x512xf32>
    %c0_13 = arith.constant 0 : index
    %c0_14 = arith.constant 0 : index
    %47 = vector.load %arg6[%c0_13, %c0_14] : memref<8x512xf32, #tpu.memory_space<vmem>>, vector<1x512xf32>
    tpu.vector_store %arg6[%c0_13, %c0_14], %46 {strides = array<i32>} : memref<8x512xf32, #tpu.memory_space<vmem>>, vector<1x512xf32>,
    %48 = arith.mulf %41, %44 : vector<1x512xf32>
    %c1 = arith.constant 1 : index
    %c0_15 = arith.constant 0 : index
    %49 = vector.load %arg6[%c1, %c0_15] : memref<8x512xf32, #tpu.memory_space<vmem>>, vector<1x512xf32>
    tpu.vector_store %arg6[%c1, %c0_15], %48 {strides = array<i32>} : memref<8x512xf32, #tpu.memory_space<vmem>>, vector<1x512xf32>,
    return
  }
  func.func @transform_0(%arg0: i32) -> (i32, i32) {
    %c0_i32 = arith.constant 0 : i32
    %c0_i32_0 = arith.constant 0 : i32
    return %c0_i32, %arg0 : i32, i32
  }
  func.func @transform_1(%arg0: i32) -> (i32, i32) {
    %c0_i32 = arith.constant 0 : i32
    %c0_i32_0 = arith.constant 0 : i32
    %c0_i32_1 = arith.constant 0 : i32
    return %c0_i32, %c0_i32_0 : i32, i32
  }
  func.func @transform_2(%arg0: i32) -> (i32, i32) {
    %c0_i32 = arith.constant 0 : i32
    %c0_i32_0 = arith.constant 0 : i32
    %c0_i32_1 = arith.constant 0 : i32
    return %c0_i32, %c0_i32_0 : i32, i32
  }
  func.func @transform_3(%arg0: i32) -> (i32, i32) {
    %c0_i32 = arith.constant 0 : i32
    %c0_i32_0 = arith.constant 0 : i32
    %c0_i32_1 = arith.constant 0 : i32
    return %c0_i32, %c0_i32_0 : i32, i32
  }
  func.func @transform_4(%arg0: i32) -> (i32, i32) {
    %c0_i32 = arith.constant 0 : i32
    %c0_i32_0 = arith.constant 0 : i32
    %c0_i32_1 = arith.constant 0 : i32
    return %c0_i32, %c0_i32_0 : i32, i32
  }
  func.func @transform_5(%arg0: i32) -> (i32, i32) {
    %c0_i32 = arith.constant 0 : i32
    %c0_i32_0 = arith.constant 0 : i32
    return %c0_i32, %arg0 : i32, i32
  }
}

</mosaic_0001>

<bundles_post_ra>
// kernel: tpu_custom_call.1
= control target key start
LH: loop header
LB: loop body
LE: loop exit
PB: predicated region body
PF: predicated region fallthrough
CT: control target
= control target key end

     0   :  { %10 = vsyncpa [#allocation3], 0  ;;  %s3132_s0 = inlined_call_operand.vmem [shape: f32[4,1024], index: 0, kind: input, shape index: {}]   ;;  %s3133_s1 = inlined_call_operand.vmem [shape: f32[128,4], index: 1, kind: input, shape index: {}]   ;;  %s3134_s2 = inlined_call_operand.vmem [shape: f32[128,1], index: 2, kind: input, shape index: {}]   ;;  %s3135_s3 = inlined_call_operand.vmem [shape: f32[8,128], index: 3, kind: input, shape index: {}]   ;;  %s3136_s4 = inlined_call_operand.vmem [shape: f32[8,1], index: 4, kind: input, shape index: {}]   ;;  %s3137_s5 = inlined_call_operand.hbm [shape: f32[8,1024], index: 5, kind: output, shape index: {}]  }
   0x1   :  { %12 = vsyncpa [#allocation3 + $0x1], 0  ;;  %s2014_s18 = smov 0   ;;  %s2016_s19 = smov 0  }
   0x2   :  { %s2018_s20 = smov 0   ;;  %s2020_s21 = smov 0  }
   0x3 LB: > { %s2035_s22 = sadd.s32 4294967295, %s1975_s21   ;;  %s1724_s23 = sadd.s32 4294967294, %s1975_s21   ;;  %s1975_s21 = sphi %s2020_s21, %s3334_s21   ;;  %s1971_s20 = sphi %s2018_s20, %s3333_s20   ;;  %s1967_s19 = sphi %s2016_s19, %s3332_s19   ;;  %s1963_s18 = sphi %s2014_s18, %s3331_s18  }
   0x4   : > { %s2039_s24 = sadd.s32 1, %s1975_s21   ;;  %s135_s25 = sadd.s32 1, %s1971_s20 }
   0x5   : > { %s132_s26 = ssub.s32 %s1975_s21, %s2039_s24  ;;  %p145_p0 = scmp.ne.s32.totalorder %s1971_s20, %s1967_s19 }
   0x6   : > { %p133_p1 = scmp.eq.s32.totalorder %s132_s26, 0  ;;  %p146_p2 = scmp.eq.s32.totalorder %s2035_s22, 1 }
   0x7   : > { %p151_p3 = scmp.ne.s32.totalorder %s1967_s19, %s1963_s18  ;;  %p152_p4 = scmp.eq.s32.totalorder %s1724_s23, 1 }
   0x8   : > { %s2050_s27 = scalar_select %p133_p1, %s1971_s20, %s135_s25  }
   0x9   : > { %p2052_p5 = por %p146_p2, %p145_p0  ;;  %p2056_p6 = por %p152_p4, %p151_p3 }
   0xa   : > { %p1727_p7 = scmp.ge.s32.totalorder %s1975_s21, 1  ;;  %p191_p8 = scmp.lt.s32.totalorder %s1975_s21, 3 }
   0xc   : > { %p192_p9 = pnand %p1727_p7, %p191_p8 }
   0xe   : > { %195 = sbr.rel (%p192_p9) target bundleno = 683 (0x2ab), region = 40 }
  0x15   : > { %v232_v0 = vld [vmem:[%s3133_s1 + $0x20] sm:$0xff]  ;;  %v3141_v2 = vmov 1   ;;  %v229_v4 = vld [vmem:[%s3133_s1 + $0x8] sm:$0xff]  ;;  %v3142_v6 = vmov 2   ;;  %v230_v7 = vld [vmem:[%s3133_s1 + $0x10] sm:$0xff]  ;;  %v3143_v8 = vmov 0   ;;  %v3138_v38 = vlaneseq }
  0x16   : > { %v228_v1 = vld [vmem:[%s3133_s1] sm:$0xff]  ;;  %1854 = vset.pattern.permute.xlu0 %v3141_v2  ;;  %1847 = vset.pattern.permute.xlu1 %v3141_v2  ;;  %v231_v9 = vld [vmem:[%s3133_s1 + $0x18] sm:$0xff]  ;;  %v3139_v10 = vmov 3   ;;  %v233_v11 = vld [vmem:[%s3133_s1 + $0x28] sm:$0xff]  ;;  %s1729_s7 = sshll.u32 %s2035_s22, 2  ;;  %s216_s14 = sand.u32 1, %s1967_s19  }
  0x17   : > { %443 = vperm.xlu0 %1854, %v232_v0   ;;  %427 = vperm.xlu1 %1847, %v228_v1   ;;  %v2073_v3 = vld [vmem:[%s3133_s1 + $0x40] sm:$0xff]  ;;  %v235_v12 = vld [vmem:[%s3133_s1 + $0x38] sm:$0xff]  ;;  %v1111_v15 = vld [vmem:[%s3134_s2 + $0x8] sm:$0xff]  ;;  %p220_p10 = scmp.lt.s32.totalorder %s1729_s7, 7  ;;  %v2216_v41 = vshrl.u32 %v3138_v38, 7  ;;  %s1728_s15 = sshll.u32 %s216_s14, 5 }
  0x18   : > { %v2082_v5 = vld [vmem:[%s3133_s1 + $0x60] sm:$0xff]  ;;  %v2113_v13 = vld [vmem:[%s3133_s1 + $0x58] sm:$0xff]  ;;  %v2127_v16 = vld [vmem:[%s3133_s1 + $0x70] sm:$0xff]  ;;  %s3073_s16 = scalar_lea.vmem [#allocation2], %s1728_s15  ;;  %s1737_s17 = sshll.u32 %s2035_s22, 9 }
  0x19   : > { %v1110_v14 = vld [vmem:[%s3134_s2] sm:$0xff]  ;;  %3200 = vst [vmem:[#allocation5_spill] sm:$0xff] %v2127_v16  ;;  %v234_v17 = vld [vmem:[%s3133_s1 + $0x30] sm:$0xff]  ;;  %v1113_v18 = vld [vmem:[%s3134_s2 + $0x18] sm:$0xff]  ;;  %s3336_s7 = smov (!%p220_p10, %s1729_s7), 7  ;;  %v492_v45 = vsub.s32 1, %v2216_v41  ;;  %s3087_s30 = scalar_lea.hbm %s3137_s5, %s1737_s17 }
  0x1a   : > { %v1112_v19 = vld [vmem:[%s3134_s2 + $0x10] sm:$0xff]  ;;  %v1117_v20 = vld [vmem:[%s3134_s2 + $0x38] sm:$0xff]  ;;  %v237_v22 = vld [vmem:[%s3133_s1 + $0x48] sm:$0xff]  ;;  %s1730_s8 = sshll.u32 %s3336_s7, 2  ;;  %3202 = vst [vmem:[#allocation7_spill] sm:$0xff] %v2216_v41  ;;  %v496_v46 = vsub.s32 5, %v2216_v41 }
  0x1b   : > { %459 = vperm.xlu0 %1854, %v2073_v3   ;;  %431 = vperm.xlu1 %1847, %v229_v4   ;;  %v2155_v21 = vld [vmem:[%s3133_s1 + $0x78] sm:$0xff]  ;;  %v1123_v24 = vld [vmem:[%s3134_s2 + $0x68] sm:$0xff]  ;;  %v1335_v25 = vld [vmem:[%s3136_s4] sm:$0xff]  ;;  %s223_s13 = scalar_lea.vmem %s3132_s0, %s1730_s8  ;;  %v720_v49 = vsub.s32 2, %v2216_v41  ;;  %v724_v50 = vsub.s32 6, %v2216_v41  ;;  %v328_v52 = vsub.s32 0, %v2216_v41 }
  0x1c   : > { %3201 = vst [vmem:[#allocation6_spill] sm:$0xff] %v2155_v21  ;;  %v1121_v23 = vld [vmem:[%s3134_s2 + $0x58] sm:$0xff]  ;;  %v1114_v26 = vld [vmem:[%s3134_s2 + $0x20] sm:$0xff]  ;;  %v1115_v27 = vld [vmem:[%s3134_s2 + $0x28] sm:$0xff]  ;;  %v332_v53 = vsub.s32 4, %v2216_v41  ;;  %v948_v59 = vsub.s32 3, %v2216_v41 }
  0x1d   : > { %v2188_v30 = vld [vmem:[%s3133_s1 + $0x50] sm:$0xff]  ;;  %v226_v47 = vld [vmem:[%s223_s13] sm:$0xff]  ;;  %v227_v48 = vld [vmem:[%s223_s13 + $0x8] sm:$0xff]  ;;  %v952_v60 = vsub.s32 7, %v2216_v41  ;;  %s1665_s23 = sshll.u32 %s3073_s16, 4  ;;  %s1651_s6 = scalar_lea.sflag [#allocation3], %s216_s14  ;;  %s3089_s23 = int_to_ptr.vmem [resolvable:$true] %s1665_s23 }
  0x1e   : > { %v1116_v42 = vld [vmem:[%s3134_s2 + $0x30] sm:$0xff]  ;;  %v493_v55 = vrot.slane %v226_v47, %v492_v45  ;;  %v497_v56 = vrot.slane %v226_v47, %v496_v46  ;;  %v501_v57 = vrot.slane %v227_v48, %v492_v45  ;;  %v505_v58 = vrot.slane %v227_v48, %v496_v46  ;;  %s1913_s7 = scalar_lea.vmem %s3089_s23, 512  ;;  %s1983_s22 = smov [#allocation2]  }
  0x1f   : > { %475 = vperm.xlu0 %1854, %v2082_v5   ;;  %1848 = vset.pattern.permute.xlu1 %v3142_v6  ;;  %v721_v61 = vrot.slane %v226_v47, %v720_v49  ;;  %v729_v62 = vrot.slane %v227_v48, %v720_v49  ;;  %v725_v63 = vrot.slane %v226_v47, %v724_v50  ;;  %p1914_p11 = scmp.ne.s32.totalorder %s3089_s23, %s1913_s7  ;;  %s1917_s8 = sshll.u32 %s1983_s22, 4  ;;  %s1918_s8 = int_to_ptr.vmem [resolvable:$false] %s1917_s8 }
  0x20   : > { %659 = vperm.xlu1 %1848, %v229_v4   ;;  %s1919_s9 = scalar_lea.vmem %s1918_s8, 1024  ;;  %p1920_p0 = scmp.lt.s32.totalorder %s3089_s23, %s1918_s8 }
  0x21   : > { %p1915_p12 = pnand %p1914_p11, %p2052_p5  ;;  %p1921_p1 = scmp.lt.s32.totalorder %s1919_s9, %s1913_s7 }
  0x23   : > { %1875 = vset.pattern.permute.xlu0 %v3142_v6  ;;  %p1916_p13 = pneg %p1915_p12  ;;  %p1922_p2 = por %p1921_p1, %p1920_p0 }
  0x24   : > { %655 = vperm.xlu0 %1875, %v228_v1   ;;  %1849 = vset.pattern.permute.xlu1 %v3143_v8 }
  0x25   : > { %256 = vperm.xlu1 %1849, %v230_v7   ;;  %p1923_p3 = pnand %p1922_p2, %p1916_p13 }
  0x28   : > { %667 = vperm.xlu0 %1875, %v231_v9  }
  0x29   : > { %1850 = vset.pattern.permute.xlu1 %v3141_v2 }
  0x2a   : > { %435 = vperm.xlu1 %1850, %v230_v7  }
  0x2c   : > { %671 = vperm.xlu0 %1875, %v232_v0  }
  0x2e   : > { %439 = vperm.xlu1 %1850, %v231_v9  }
  0x30   : > { %687 = vperm.xlu0 %1875, %v2073_v3  }
  0x32   : > { %1851 = vset.pattern.permute.xlu1 %v3139_v10 }
  0x33   : > { %887 = vperm.xlu1 %1851, %v229_v4  }
  0x34   : > { %703 = vperm.xlu0 %1875, %v2082_v5  }
  0x37   : > { %1852 = vset.pattern.permute.xlu1 %v3142_v6 }
  0x38   : > { %1879 = vset.pattern.permute.xlu0 %v3139_v10  ;;  %663 = vperm.xlu1 %1852, %v230_v7  }
  0x39   : > { %883 = vperm.xlu0 %1879, %v228_v1  }
  0x3c   : > { %1853 = vset.pattern.permute.xlu1 %v3143_v8 }
  0x3d   : > { %895 = vperm.xlu0 %1879, %v231_v9   ;;  %266 = vperm.xlu1 %1853, %v232_v0  }
  0x41   : > { %899 = vperm.xlu0 %1879, %v232_v0   ;;  %271 = vperm.xlu1 %1853, %v233_v11   ;;  %v733_v0 = vrot.slane %v227_v48, %v724_v50 }
  0x45   : > { %911 = vperm.xlu0 %1879, %v235_v12   ;;  %1855 = vset.pattern.permute.xlu1 %v3141_v2 }
  0x46   : > { %447 = vperm.xlu1 %1855, %v233_v11  }
  0x49   : > { %915 = vperm.xlu0 %1879, %v2073_v3  }
  0x4a   : > { %1856 = vset.pattern.permute.xlu1 %v3139_v10 }
  0x4b   : > { %891 = vperm.xlu1 %1856, %v230_v7  }
  0x4d   : > { %927 = vperm.xlu0 %1879, %v2113_v13  }
  0x4f   : > { %1857 = vset.pattern.permute.xlu1 %v3143_v8 }
  0x50   : > { %1128 = vperm.xlu1 %1857, %v1110_v14   ;;  %v2251_v14 = vrot.slane %v505_v58, %v492_v45 }
  0x51   : > { %931 = vperm.xlu0 %1879, %v2082_v5  }
  0x52   : > { %3208 = vst [vmem:[#allocation13_spill] sm:$0xff] %v2251_v14 }
  0x54   : > { %1133 = vperm.xlu1 %1857, %v1111_v15  }
  0x55   : > { %939 = vperm.xlu0 %1879, %v2127_v16  }
  0x58   : > { %1858 = vset.pattern.permute.xlu1 %v3142_v6 }
  0x59   : > { %1886 = vset.pattern.permute.xlu0 %v3143_v8  ;;  %675 = vperm.xlu1 %1858, %v233_v11  }
  0x5a   : > { %246 = vperm.xlu0 %1886, %v228_v1   ;;  %v329_v1 = vrot.slane %v226_v47, %v328_v52 }
  0x5d   : > { %1859 = vset.pattern.permute.xlu1 %v3143_v8 }
  0x5e   : > { %251 = vperm.xlu0 %1886, %v229_v4   ;;  %276 = vperm.xlu1 %1859, %v234_v17   ;;  %v337_v4 = vrot.slane %v227_v48, %v328_v52 }
  0x62   : > { %261 = vperm.xlu0 %1886, %v231_v9   ;;  %1860 = vset.pattern.permute.xlu1 %v3141_v2  ;;  %v2245_v9 = vrot.slane %v493_v55, %v492_v45 }
  0x63   : > { %451 = vperm.xlu1 %1860, %v234_v17  }
  0x64   : > { %3205 = vst [vmem:[#allocation10_spill] sm:$0xff] %v2245_v9 }
  0x66   : > { %281 = vperm.xlu0 %1886, %v235_v12  }
  0x67   : > { %455 = vperm.xlu1 %1860, %v235_v12  }
  0x6a   : > { %1143 = vperm.xlu0 %1886, %v1113_v18   ;;  %v953_v18 = vrot.slane %v226_v47, %v952_v60 }
  0x6b   : > { %1861 = vset.pattern.permute.xlu1 %v3139_v10 }
  0x6c   : > { %903 = vperm.xlu1 %1861, %v233_v11   ;;  %v2247_v11 = vrot.slane %v497_v56, %v492_v45 }
  0x6e   : > { %286 = vperm.xlu0 %1886, %v2073_v3   ;;  %v333_v3 = vrot.slane %v226_v47, %v332_v53  ;;  %3206 = vst [vmem:[#allocation11_spill] sm:$0xff] %v2247_v11 }
  0x70   : > { %1862 = vset.pattern.permute.xlu1 %v3143_v8 }
  0x71   : > { %1138 = vperm.xlu1 %1862, %v1112_v19   ;;  %v957_v19 = vrot.slane %v227_v48, %v948_v59 }
  0x72   : > { %301 = vperm.xlu0 %1886, %v2113_v13  }
  0x73   : > { %v2292_v56 = vrot.slane %v957_v19, %v948_v59 }
  0x75   : > { %1863 = vset.pattern.permute.xlu1 %v3142_v6 }
  0x76   : > { %679 = vperm.xlu1 %1863, %v234_v17   ;;  %1163 = vperm.xlu0 %1886, %v1117_v20   ;;  %v961_v20 = vrot.slane %v227_v48, %v952_v60 }
  0x7a   : > { %683 = vperm.xlu1 %1863, %v235_v12   ;;  %306 = vperm.xlu0 %1886, %v2082_v5   ;;  %v341_v5 = vrot.slane %v227_v48, %v332_v53  ;;  %v2249_v12 = vrot.slane %v501_v57, %v492_v45  ;;  %v2294_v57 = vrot.slane %v961_v20, %v948_v59 }
  0x7c   : > { %3207 = vst [vmem:[#allocation12_spill] sm:$0xff] %v2249_v12  ;;  %v2275_v45 = vrot.slane %v341_v5, %v328_v52 }
  0x7e   : > { %1864 = vset.pattern.permute.xlu1 %v3143_v8  ;;  %321 = vperm.xlu0 %1886, %v2155_v21   ;;  %3215 = vst [vmem:[#allocation20_spill] sm:$0xff] %v2275_v45 }
  0x7f   : > { %291 = vperm.xlu1 %1864, %v237_v22  }
  0x82   : > { %1183 = vperm.xlu0 %1886, %v1121_v23   ;;  %v2258_v23 = vrot.slane %v729_v62, %v720_v49 }
  0x83   : > { %1865 = vset.pattern.permute.xlu1 %v3141_v2 }
  0x84   : > { %463 = vperm.xlu1 %1865, %v237_v22   ;;  %3210 = vst [vmem:[#allocation15_spill] sm:$0xff] %v2258_v23 }
  0x86   : > { %1193 = vperm.xlu0 %1886, %v1123_v24   ;;  %v2260_v24 = vrot.slane %v725_v63, %v720_v49 }
  0x88   : > { %1866 = vset.pattern.permute.xlu1 %v3139_v10  ;;  %3211 = vst [vmem:[#allocation16_spill] sm:$0xff] %v2260_v24 }
  0x89   : > { %907 = vperm.xlu1 %1866, %v234_v17   ;;  %v949_v17 = vrot.slane %v226_v47, %v948_v59 }
  0x8a   : > { %1338 = vperm.xlu0 %1886, %v1335_v25   ;;  %v2262_v25 = vrot.slane %v733_v0, %v720_v49 }
  0x8b   : > { %v2288_v55 = vrot.slane %v949_v17, %v948_v59 }
  0x8c   : > { %3212 = vst [vmem:[#allocation17_spill] sm:$0xff] %v2262_v25 }
  0x8d   : > { %1867 = vset.pattern.permute.xlu1 %v3143_v8 }
  0x8e   : > { %1148 = vperm.xlu1 %1867, %v1114_v26   ;;  %v2267_v26 = vld [vmem:[%s3133_s1 + $0x68] sm:$0xff] }
  0x92   : > { %1153 = vperm.xlu1 %1867, %v1115_v27   ;;  %v2269_v27 = vrot.slane %v329_v1, %v328_v52 }
  0x94   : > { %3213 = vst [vmem:[#allocation18_spill] sm:$0xff] %v2269_v27 }
  0x96   : > { %1868 = vset.pattern.permute.xlu1 %v3142_v6  ;;  %v2181_v28 = vpop.permute.xlu1 %427  ;;  %v2183_v29 = vpop.permute.xlu0 %443 }
  0x97   : > { %691 = vperm.xlu1 %1868, %v237_v22   ;;  %v542_v46 = vmul.f32 %v2245_v9, %v2183_v29  ;;  %v543_v47 = vmul.f32 %v2247_v11, %v2183_v29  ;;  %v544_v48 = vmul.f32 %v2249_v12, %v2183_v29 }
  0x9a   : > { %v2190_v31 = vpop.permute.xlu1 %431  ;;  %v2192_v32 = vpop.permute.xlu0 %459 }
  0x9b   : > { %1869 = vset.pattern.permute.xlu1 %v3143_v8 }
  0x9c   : > { %296 = vperm.xlu1 %1869, %v2188_v30  }
  0x9e   : > { %v2196_v33 = vpop.permute.xlu0 %475 }
  0x9f   : > { %v2198_v34 = vpop.permute.xlu1 %659  ;;  %v2424_v41 = vmul.f32 %v2251_v14, %v2196_v33 }
  0xa0   : > { %1870 = vset.pattern.permute.xlu1 %v3141_v2 }
  0xa1   : > { %467 = vperm.xlu1 %1870, %v2188_v30   ;;  %3237 = vst [vmem:[#allocation42_spill] sm:$0xff] %v2424_v41 }
  0xa3   : > { %v2203_v35 = vpop.permute.xlu0 %655 }
  0xa4   : > { %v2205_v36 = vpop.permute.xlu1 %256 }
  0xa5   : > { %471 = vperm.xlu1 %1870, %v2113_v13  }
  0xa7   : > { %v2208_v37 = vpop.permute.xlu0 %667 }
  0xa9   : > { %1871 = vset.pattern.permute.xlu1 %v3139_v10  ;;  %v2211_v39 = vpop.permute.xlu1 %435 }
  0xaa   : > { %919 = vperm.xlu1 %1871, %v237_v22   ;;  %v2256_v22 = vrot.slane %v721_v61, %v720_v49  ;;  %v545_v49 = vmul.f32 %v2251_v14, %v2183_v29 }
  0xab   : > { %v2213_v40 = vpop.permute.xlu0 %671 }
  0xac   : > { %3209 = vst [vmem:[#allocation14_spill] sm:$0xff] %v2256_v22  ;;  %v770_v62 = vmul.f32 %v2256_v22, %v2213_v40  ;;  %v771_v63 = vmul.f32 %v2260_v24, %v2213_v40  ;;  %v773_v0 = vmul.f32 %v2262_v25, %v2213_v40 }
  0xad   : > { %v2221_v43 = vpop.permute.xlu1 %439 }
  0xae   : > { %1872 = vset.pattern.permute.xlu1 %v3143_v8 }
  0xaf   : > { %1158 = vperm.xlu1 %1872, %v1116_v42   ;;  %v2227_v44 = vpop.permute.xlu0 %687  ;;  %v2273_v42 = vrot.slane %v337_v4, %v328_v52 }
  0xb0   : > { %3203 = vst [vmem:[#allocation8_spill] sm:$0xff] %v2227_v44 }
  0xb2   : > { %v2233_v51 = vpop.permute.xlu1 %887 }
  0xb3   : > { %1873 = vset.pattern.permute.xlu1 %v3142_v6  ;;  %v2238_v54 = vpop.permute.xlu0 %703 }
  0xb4   : > { %3204 = vst [vmem:[#allocation9_spill] sm:$0xff] %v2238_v54  ;;  %695 = vperm.xlu1 %1873, %v2188_v30   ;;  %v538_v54 = vmul.f32 %v2245_v9, %v2221_v43 }
  0xb7   : > { %v2243_v7 = vpop.permute.xlu1 %663 }
  0xb8   : > { %v2253_v15 = vpop.permute.xlu0 %883  ;;  %699 = vperm.xlu1 %1873, %v2113_v13   ;;  %v2271_v13 = vrot.slane %v333_v3, %v328_v52  ;;  %v2290_v52 = vrot.slane %v953_v18, %v948_v59  ;;  %v772_v59 = vmul.f32 %v2258_v23, %v2213_v40 }
  0xba   : > { %3214 = vst [vmem:[#allocation19_spill] sm:$0xff] %v2271_v13 }
  0xbc   : > { %v2285_v50 = vpop.permute.xlu0 %895  ;;  %1874 = vset.pattern.permute.xlu1 %v3143_v8  ;;  %v267_v53 = vpop.permute.xlu1 %266 }
  0xbd   : > { %311 = vperm.xlu1 %1874, %v2267_v26   ;;  %v378_v58 = vmul.f32 %v2269_v27, %v267_v53  ;;  %v379_v60 = vmul.f32 %v2271_v13, %v267_v53  ;;  %v380_v29 = vmul.f32 %v2273_v42, %v267_v53  ;;  %v381_v61 = vmul.f32 %v2275_v45, %v267_v53 }
  0xbf   : > { %v606_v1 = vadd.f32 %v542_v46, %v378_v58  ;;  %v607_v3 = vadd.f32 %v543_v47, %v379_v60  ;;  %v608_v4 = vadd.f32 %v544_v48, %v380_v29  ;;  %v609_v5 = vadd.f32 %v545_v49, %v381_v61 }
  0xc0   : > { %v900_v17 = vpop.permute.xlu0 %899  ;;  %v2309_v18 = vpop.permute.xlu1 %271 }
  0xc1   : > { %3216 = vst [vmem:[#allocation21_spill] sm:$0xff] %v2309_v18  ;;  %1876 = vset.pattern.permute.xlu1 %v3141_v2  ;;  %v998_v19 = vmul.f32 %v2288_v55, %v900_v17  ;;  %v999_v20 = vmul.f32 %v2290_v52, %v900_v17  ;;  %v1000_v53 = vmul.f32 %v2292_v56, %v900_v17 }
  0xc2   : > { %v1001_v38 = vmul.f32 %v2294_v57, %v900_v17  ;;  %479 = vperm.xlu1 %1876, %v2267_v26   ;;  %v834_v40 = vadd.f32 %v770_v62, %v606_v1  ;;  %v835_v46 = vadd.f32 %v771_v63, %v607_v3  ;;  %v836_v47 = vadd.f32 %v772_v59, %v608_v4  ;;  %v1118_v63 = vld [vmem:[%s3134_s2 + $0x40] sm:$0xff] }
  0xc3   : > { %v837_v48 = vadd.f32 %v773_v0, %v609_v5  ;;  %v1119_v0 = vld [vmem:[%s3134_s2 + $0x48] sm:$0xff]  ;;  %v2350_v3 = vmul.f32 %v2245_v9, %v2181_v28  ;;  %v2354_v4 = vmul.f32 %v2247_v11, %v2181_v28  ;;  %v2358_v5 = vmul.f32 %v2249_v12, %v2181_v28 }
  0xc4   : > { %v2317_v49 = vpop.permute.xlu0 %911  ;;  %v2323_v60 = vadd.f32 %v998_v19, %v834_v40  ;;  %v2325_v29 = vadd.f32 %v999_v20, %v835_v46  ;;  %v2327_v61 = vadd.f32 %v1000_v53, %v836_v47  ;;  %v2362_v19 = vmul.f32 %v2251_v14, %v2181_v28 }
  0xc5   : > { %3217 = vst [vmem:[#allocation22_spill] sm:$0xff] %v2317_v49  ;;  %v2319_v58 = vpop.permute.xlu1 %447  ;;  %v2329_v17 = vadd.f32 %v1001_v38, %v837_v48  ;;  %v2366_v20 = vmul.f32 %v2245_v9, %v2190_v31  ;;  %v2370_v53 = vmul.f32 %v2247_v11, %v2190_v31  ;;  %v2376_v46 = vmul.f32 %v2249_v12, %v2190_v31 }
  0xc6   : > { %3218 = vst [vmem:[#allocation23_spill] sm:$0xff] %v2319_v58  ;;  %1877 = vset.pattern.permute.xlu1 %v3139_v10  ;;  %3219 = vst [vmem:[#allocation24_spill] sm:$0xff] %v2323_v60  ;;  %v2380_v47 = vmul.f32 %v2251_v14, %v2190_v31  ;;  %v2384_v28 = vmul.f32 %v2245_v9, %v2192_v32  ;;  %v2388_v48 = vmul.f32 %v2247_v11, %v2192_v32 }
  0xc7   : > { %923 = vperm.xlu1 %1877, %v2188_v30   ;;  %3220 = vst [vmem:[#allocation25_spill] sm:$0xff] %v2325_v29  ;;  %3221 = vst [vmem:[#allocation26_spill] sm:$0xff] %v2327_v61  ;;  %v2399_v31 = vmul.f32 %v2251_v14, %v2192_v32  ;;  %v2403_v10 = vmul.f32 %v2245_v9, %v2196_v33  ;;  %v2407_v2 = vmul.f32 %v2247_v11, %v2196_v33 }
  0xc8   : > { %3222 = vst [vmem:[#allocation27_spill] sm:$0xff] %v2329_v17  ;;  %v2331_v62 = vpop.permute.xlu0 %915  ;;  %3227 = vst [vmem:[#allocation32_spill] sm:$0xff] %v2384_v28  ;;  %v2432_v49 = vmul.f32 %v2260_v24, %v2198_v34  ;;  %v2436_v17 = vmul.f32 %v2262_v25, %v2198_v34  ;;  %v2440_v61 = vmul.f32 %v2256_v22, %v2203_v35 }
  0xc9   : > { %3223 = vst [vmem:[#allocation28_spill] sm:$0xff] %v2331_v62  ;;  %3228 = vst [vmem:[#allocation33_spill] sm:$0xff] %v2388_v48  ;;  %v536_v29 = vmul.f32 %v2249_v12, %v2211_v39  ;;  %v537_v60 = vmul.f32 %v2251_v14, %v2211_v39  ;;  %v373_v48 = vmul.f32 %v2275_v45, %v2205_v36 }
  0xca   : > { %v2336_v59 = vpop.permute.xlu1 %891  ;;  %3231 = vst [vmem:[#allocation36_spill] sm:$0xff] %v2399_v31  ;;  %3232 = vst [vmem:[#allocation37_spill] sm:$0xff] %v2403_v10  ;;  %v371_v10 = vmul.f32 %v2271_v13, %v2205_v36  ;;  %v2471_v28 = vmul.f32 %v2256_v22, %v2208_v37 }
  0xcb   : > { %1878 = vset.pattern.permute.xlu1 %v3143_v8  ;;  %3233 = vst [vmem:[#allocation38_spill] sm:$0xff] %v2407_v2  ;;  %v2416_v8 = vmul.f32 %v2258_v23, %v2198_v34  ;;  %v370_v2 = vmul.f32 %v2269_v27, %v2205_v36  ;;  %v601_v58 = vadd.f32 %v537_v60, %v373_v48 }
  0xcc   : > { %1168 = vperm.xlu1 %1878, %v1118_v63   ;;  %v2339_v30 = vpop.permute.xlu0 %927  ;;  %v2508_v48 = vmul.f32 %v2288_v55, %v2233_v51 }
  0xcd   : > { %3224 = vst [vmem:[#allocation29_spill] sm:$0xff] %v2339_v30  ;;  %3235 = vst [vmem:[#allocation40_spill] sm:$0xff] %v2416_v8  ;;  %v535_v30 = vmul.f32 %v2247_v11, %v2211_v39  ;;  %v540_v8 = vmul.f32 %v2249_v12, %v2221_v43 }
  0xce   : > { %3242 = vst [vmem:[#allocation46_spill] sm:$0xff] %v2508_v48 }
  0xcf   : > { %v2344_v1 = vpop.permute.xlu1 %1128 }
  0xd0   : > { %1173 = vperm.xlu1 %1878, %v1119_v0   ;;  %v2346_v38 = vpop.permute.xlu0 %931  ;;  %v2395_v0 = vmul.f32 %v2249_v12, %v2192_v32  ;;  %v2420_v32 = vmul.f32 %v2249_v12, %v2196_v33  ;;  %v2444_v33 = vmul.f32 %v2260_v24, %v2203_v35  ;;  %v2515_v12 = vmul.f32 %v2290_v52, %v2233_v51 }
  0xd1   : > { %3225 = vst [vmem:[#allocation30_spill] sm:$0xff] %v2346_v38  ;;  %v2484_v38 = vmul.f32 %v2262_v25, %v2208_v37 }
  0xd2   : > { %3230 = vst [vmem:[#allocation35_spill] sm:$0xff] %v2395_v0  ;;  %3236 = vst [vmem:[#allocation41_spill] sm:$0xff] %v2420_v32  ;;  %v2458_v32 = vmul.f32 %v2262_v25, %v2203_v35  ;;  %v3239_v0 = vmov 0  }
  0xd3   : > { %v2372_v40 = vpop.permute.xlu1 %1133 }
  0xd4   : > { %3226 = vst [vmem:[#allocation31_spill] sm:$0xff] %v2372_v40  ;;  %1880 = vset.pattern.permute.xlu1 %v3142_v6  ;;  %v2391_v63 = vpop.permute.xlu0 %939  ;;  %v2412_v6 = vmul.f32 %v2256_v22, %v2198_v34  ;;  %v2454_v34 = vmul.f32 %v2258_v23, %v2203_v35  ;;  %v2475_v35 = vmul.f32 %v2260_v24, %v2208_v37 }
  0xd5   : > { %3229 = vst [vmem:[#allocation34_spill] sm:$0xff] %v2391_v63  ;;  %707 = vperm.xlu1 %1880, %v2267_v26   ;;  %v534_v63 = vmul.f32 %v2245_v9, %v2211_v39  ;;  %v372_v39 = vmul.f32 %v2273_v42, %v2205_v36  ;;  %v599_v36 = vadd.f32 %v535_v30, %v371_v10 }
  0xd6   : > { %3234 = vst [vmem:[#allocation39_spill] sm:$0xff] %v2412_v6  ;;  %v539_v40 = vmul.f32 %v2247_v11, %v2221_v43  ;;  %v762_v6 = vmul.f32 %v2256_v22, %v2243_v7  ;;  %v2504_v30 = vmul.f32 %v2256_v22, %v2227_v44  ;;  %v2536_v11 = vmul.f32 %v2292_v56, %v2253_v15 }
  0xd7   : > { %v598_v62 = vadd.f32 %v534_v63, %v370_v2  ;;  %v600_v18 = vadd.f32 %v536_v29, %v372_v39  ;;  %v764_v2 = vmul.f32 %v2258_v23, %v2243_v7  ;;  %v541_v29 = vmul.f32 %v2251_v14, %v2221_v43 }
  0xd8   : > { %v2450_v41 = vpop.permute.xlu1 %675  ;;  %3241 = vst [vmem:[#allocation45_spill] sm:$0xff] %v2504_v30  ;;  %v765_v63 = vmul.f32 %v2262_v25, %v2243_v7  ;;  %v3243_v39 = vmov 1   ;;  %v2519_v43 = vmul.f32 %v2292_v56, %v2233_v51  ;;  %v2526_v14 = vmul.f32 %v2294_v57, %v2233_v51  ;;  %3246 = vst [vmem:[#allocation49_spill] sm:$0xff] %v2536_v11 }
  0xd9   : > { %3238 = vst [vmem:[#allocation43_spill] sm:$0xff] %v2450_v41  ;;  %v247_v31 = vpop.permute.xlu0 %246  ;;  %1881 = vset.pattern.permute.xlu1 %v3239_v0  ;;  %v2480_v41 = vmul.f32 %v2258_v23, %v2208_v37  ;;  %v763_v37 = vmul.f32 %v2260_v24, %v2243_v7  ;;  %v2530_v7 = vmul.f32 %v2288_v55, %v2253_v15 }
  0xda   : > { %316 = vperm.xlu1 %1881, %v2127_v16   ;;  %3244 = vst [vmem:[#allocation47_spill] sm:$0xff] %v2519_v43  ;;  %v365_v30 = vmul.f32 %v2275_v45, %v247_v31  ;;  %v826_v9 = vadd.f32 %v762_v6, %v598_v62  ;;  %v828_v25 = vadd.f32 %v764_v2, %v600_v18 }
  0xdb   : > { %3245 = vst [vmem:[#allocation48_spill] sm:$0xff] %v2530_v7  ;;  %v827_v22 = vadd.f32 %v763_v37, %v599_v36  ;;  %v985_v23 = vmul.f32 %v2294_v57, %v2253_v15  ;;  %v829_v51 = vadd.f32 %v765_v63, %v601_v58  ;;  %v362_v44 = vmul.f32 %v2269_v27, %v247_v31 }
  0xdc   : > { %v593_v11 = vadd.f32 %v2362_v19, %v365_v30  ;;  %v995_v58 = vmul.f32 %v2290_v52, %v2285_v50  ;;  %v997_v19 = vmul.f32 %v2294_v57, %v2285_v50 }
  0xdd   : > { %v252_v10 = vpop.permute.xlu0 %251  ;;  %v2498_v60 = vpop.permute.xlu1 %276  ;;  %v590_v2 = vadd.f32 %v2350_v3, %v362_v44  ;;  %v990_v44 = vmul.f32 %v2288_v55, %v2336_v59 }
  0xde   : > { %3240 = vst [vmem:[#allocation44_spill] sm:$0xff] %v2498_v60  ;;  %1882 = vset.pattern.permute.xlu1 %v3243_v39  ;;  %v363_v60 = vmul.f32 %v2271_v13, %v247_v31  ;;  %v983_v39 = vmul.f32 %v2290_v52, %v2253_v15  ;;  %v367_v6 = vmul.f32 %v2271_v13, %v252_v10 }
  0xdf   : > { %483 = vperm.xlu1 %1882, %v2127_v16   ;;  %v364_v16 = vmul.f32 %v2273_v42, %v247_v31  ;;  %v369_v18 = vmul.f32 %v2275_v45, %v252_v10  ;;  %v994_v15 = vmul.f32 %v2288_v55, %v2285_v50  ;;  %v366_v30 = vmul.f32 %v2269_v27, %v252_v10 }
  0xe0   : > { %v591_v7 = vadd.f32 %v2354_v4, %v363_v60  ;;  %v2558_v4 = vmul.f32 %v2292_v56, %v2285_v50  ;;  %v368_v63 = vmul.f32 %v2273_v42, %v252_v10 }
  0xe1   : > { %v262_v24 = vpop.permute.xlu0 %261  ;;  %v592_v60 = vadd.f32 %v2358_v5, %v364_v16  ;;  %v991_v16 = vmul.f32 %v2290_v52, %v2336_v59 }
  0xe2   : > { %v374_v43 = vmul.f32 %v2269_v27, %v262_v24  ;;  %v2543_v48 = vpop.permute.xlu1 %451  ;;  %v375_v62 = vmul.f32 %v2271_v13, %v262_v24  ;;  %v377_v31 = vmul.f32 %v2275_v45, %v262_v24  ;;  %v376_v36 = vmul.f32 %v2273_v42, %v262_v24 }
  0xe3   : > { %3247 = vst [vmem:[#allocation50_spill] sm:$0xff] %v2543_v48  ;;  %487 = vperm.xlu1 %1882, %v2155_v21   ;;  %v595_v45 = vadd.f32 %v2370_v53, %v367_v6  ;;  %v597_v13 = vadd.f32 %v2380_v47, %v369_v18  ;;  %v3249_v21 = vmov 3   ;;  %v819_v50 = vadd.f32 %v2444_v33, %v591_v7 }
  0xe4   : > { %v602_v37 = vadd.f32 %v538_v54, %v374_v43  ;;  %v821_v54 = vadd.f32 %v2458_v32, %v593_v11  ;;  %v603_v24 = vadd.f32 %v539_v40, %v375_v62  ;;  %v605_v3 = vadd.f32 %v541_v29, %v377_v31  ;;  %v1120_v40 = vld [vmem:[%s3134_s2 + $0x50] sm:$0xff] }
  0xe5   : > { %v2578_v5 = vpop.permute.xlu0 %281  ;;  %v992_v53 = vmul.f32 %v2292_v56, %v2336_v59  ;;  %v993_v47 = vmul.f32 %v2294_v57, %v2336_v59  ;;  %v604_v33 = vadd.f32 %v540_v8, %v376_v36  ;;  %v594_v32 = vadd.f32 %v2366_v20, %v366_v30  ;;  %v3255_v30 = vld [vmem:[#allocation46_spill] sm:$0xff] }
  0xe6   : > { %v2567_v48 = vpop.permute.xlu1 %455  ;;  %v830_v11 = vadd.f32 %v2471_v28, %v602_v37  ;;  %v596_v10 = vadd.f32 %v2376_v46, %v368_v63  ;;  %v818_v29 = vadd.f32 %v2440_v61, %v590_v2  ;;  %v823_v7 = vadd.f32 %v2432_v49, %v595_v45 }
  0xe7   : > { %3248 = vst [vmem:[#allocation51_spill] sm:$0xff] %v2567_v48  ;;  %1883 = vset.pattern.permute.xlu1 %v3249_v21  ;;  %v1047_v59 = vadd.f32 %v983_v39, %v819_v50  ;;  %v825_v8 = vadd.f32 %v2436_v17, %v597_v13  ;;  %v1049_v28 = vadd.f32 %v985_v23, %v821_v54  ;;  %v3250_v17 = vld [vmem:[#allocation39_spill] sm:$0xff] }
  0xe8   : > { %935 = vperm.xlu1 %1883, %v2267_v26   ;;  %v820_v26 = vadd.f32 %v2454_v34, %v592_v60  ;;  %v831_v20 = vadd.f32 %v2475_v35, %v603_v24  ;;  %v833_v46 = vadd.f32 %v2484_v38, %v605_v3  ;;  %v1054_v6 = vadd.f32 %v990_v44, %v826_v9  ;;  %v3251_v35 = vld [vmem:[#allocation48_spill] sm:$0xff]  ;;  %v3256_v50 = vld [vmem:[#allocation47_spill] sm:$0xff] }
  0xe9   : > { %v1055_v18 = vadd.f32 %v991_v16, %v827_v22  ;;  %v832_v61 = vadd.f32 %v2480_v41, %v604_v33  ;;  %v1058_v62 = vadd.f32 %v994_v15, %v830_v11  ;;  %v1056_v34 = vadd.f32 %v992_v53, %v828_v25  ;;  %v1144_v36 = vpop.permute.xlu0 %1143  ;;  %v3252_v22 = vld [vmem:[#allocation40_spill] sm:$0xff]  ;;  %v3253_v41 = vld [vmem:[#allocation49_spill] sm:$0xff] }
  0xea   : > { %v1057_v31 = vadd.f32 %v993_v47, %v829_v51  ;;  %v1051_v45 = vadd.f32 %v2515_v12, %v823_v7  ;;  %v1207_v13 = vadd.f32 %v2344_v1, %v1047_v59  ;;  %v1053_v23 = vadd.f32 %v2526_v14, %v825_v8  ;;  %v3254_v51 = vld [vmem:[#allocation31_spill] sm:$0xff] }
  0xeb   : > { %v2593_v43 = vpop.permute.xlu1 %903  ;;  %v1209_v49 = vadd.f32 %v2344_v1, %v1049_v28  ;;  %v822_v38 = vadd.f32 %v3250_v17, %v594_v32  ;;  %v1046_v9 = vadd.f32 %v3251_v35, %v818_v29  ;;  %v824_v39 = vadd.f32 %v3252_v22, %v596_v10  ;;  %v3262_v17 = vld [vmem:[#allocation16_spill] sm:$0xff]  ;;  %v3263_v35 = vld [vmem:[#allocation15_spill] sm:$0xff]  ;;  %v3264_v22 = vld [vmem:[#allocation17_spill] sm:$0xff] }
  0xec   : > { %1884 = vset.pattern.permute.xlu1 %v3239_v0  ;;  %v1048_v15 = vadd.f32 %v3253_v41, %v820_v26  ;;  %v1059_v37 = vadd.f32 %v995_v58, %v831_v20  ;;  %v1061_v25 = vadd.f32 %v997_v19, %v833_v46  ;;  %v1211_v2 = vadd.f32 %v3254_v51, %v1051_v45  ;;  %v3258_v19 = vld [vmem:[#allocation5_spill] sm:$0xff] }
  0xed   : > { %1178 = vperm.xlu1 %1884, %v1120_v40   ;;  %v1213_v12 = vadd.f32 %v3254_v51, %v1053_v23  ;;  %v1050_v63 = vadd.f32 %v3255_v30, %v822_v38  ;;  %v1206_v14 = vadd.f32 %v2344_v1, %v1046_v9  ;;  %v1052_v54 = vadd.f32 %v3256_v50, %v824_v39  ;;  %v2617_v47 = vpop.permute.xlu0 %286  ;;  %v3266_v41 = vld [vmem:[#allocation9_spill] sm:$0xff] }
  0xee   : > { %v1208_v44 = vadd.f32 %v2344_v1, %v1048_v15  ;;  %v3257_v16 = vmov 2   ;;  %v1271_v24 = vmax.f32 %v1207_v13, 0.0  ;;  %v1275_v3 = vmax.f32 %v1211_v2, 0.0  ;;  %v3270_v2 = vld [vmem:[#allocation11_spill] sm:$0xff] }
  0xef   : > { %v1273_v53 = vmax.f32 %v1209_v49, 0.0  ;;  %v1277_v58 = vmax.f32 %v1213_v12, 0.0  ;;  %v1060_v33 = vadd.f32 %v2558_v4, %v832_v61  ;;  %v1210_v11 = vadd.f32 %v3254_v51, %v1050_v63  ;;  %v3260_v49 = vld [vmem:[#allocation6_spill] sm:$0xff]  ;;  %v3272_v63 = vld [vmem:[#allocation12_spill] sm:$0xff] }
  0xf0   : > { %v1139_v60 = vpop.permute.xlu1 %1138  ;;  %v1212_v32 = vadd.f32 %v3254_v51, %v1052_v54  ;;  %v1218_v40 = vadd.f32 %v1144_v36, %v1058_v62  ;;  %v1219_v29 = vadd.f32 %v1144_v36, %v1059_v37  ;;  %v1738_v1 = vpack.c.bf16 %v1275_v3, %v1271_v24  ;;  %v3261_v62 = vld [vmem:[#allocation8_spill] sm:$0xff]  ;;  %v3268_v37 = vld [vmem:[#allocation23_spill] sm:$0xff] }
  0xf1   : > { %1885 = vset.pattern.permute.xlu1 %v3257_v16  ;;  %v1215_v10 = vadd.f32 %v1139_v60, %v1055_v18  ;;  %v1770_v26 = vpack.c.bf16 %v1277_v58, %v1273_v53  ;;  %v1270_v7 = vmax.f32 %v1206_v14, 0.0  ;;  %v1274_v59 = vmax.f32 %v1210_v11, 0.0  ;;  %v3273_v14 = vld [vmem:[#allocation13_spill] sm:$0xff] }
  0xf2   : > { %711 = vperm.xlu1 %1885, %v3258_v19   ;;  %v1272_v8 = vmax.f32 %v1208_v44, 0.0  ;;  %v1276_v28 = vmax.f32 %v1212_v32, 0.0  ;;  %v1221_v46 = vadd.f32 %v1144_v36, %v1061_v25  ;;  %1739 = vmatprep.subr.bf16.mxu0 %v1738_v1  ;;  %v1214_v45 = vadd.f32 %v1139_v60, %v1054_v6  ;;  %v3269_v25 = vld [vmem:[#allocation10_spill] sm:$0xff]  ;;  %v3274_v19 = vld [vmem:[#allocation21_spill] sm:$0xff]  ;;  %v3276_v1 = vld [vmem:[#allocation20_spill] sm:$0xff] }
  0xf3   : > { %1771 = vmatprep.subr.bf16.mxu1 %v1770_v26  ;;  %v1217_v4 = vadd.f32 %v1139_v60, %v1057_v31  ;;  %v1740_v61 = vpack.c.bf16 %v1274_v59, %v1270_v7  ;;  %v1216_v23 = vadd.f32 %v1139_v60, %v1056_v34  ;;  %v1279_v18 = vmax.f32 %v1215_v10, 0.0  ;;  %v2637_v31 = vpop.permute.xlu0 %301  ;;  %v3267_v34 = vld [vmem:[#allocation14_spill] sm:$0xff]  ;;  %v3275_v10 = vld [vmem:[#allocation19_spill] sm:$0xff] }
  0xf4   : > { %v1772_v13 = vpack.c.bf16 %v1276_v28, %v1272_v8  ;;  %v2627_v38 = vmul.f32 %v3262_v17, %v3261_v62  ;;  %v2631_v9 = vmul.f32 %v3263_v35, %v3261_v62  ;;  %v2635_v39 = vmul.f32 %v3264_v22, %v3261_v62  ;;  %3265 = vst [vmem:[#allocation48_spill] sm:$0xff] %v2637_v31 }
  0xf5   : > { %v2622_v20 = vpop.permute.xlu1 %679  ;;  %v1220_v6 = vadd.f32 %v1144_v36, %v1060_v33  ;;  %v2641_v15 = vmul.f32 %v3267_v34, %v3266_v41  ;;  %v546_v51 = vmul.f32 %v3269_v25, %v3268_v37  ;;  %v547_v12 = vmul.f32 %v3270_v2, %v3268_v37  ;;  %1741 = vmatpush1.bf16.msra.mxu0 %v1740_v61 }
  0xf6   : > { %3259 = vst [vmem:[#allocation39_spill] sm:$0xff] %v2622_v20  ;;  %715 = vperm.xlu1 %1885, %v3260_v49   ;;  %1773 = vmatpush1.bf16.msra.mxu1 %v1772_v13  ;;  %v1283_v60 = vmax.f32 %v1219_v29, 0.0  ;;  %v548_v36 = vmul.f32 %v3272_v63, %v3268_v37  ;;  %v549_v50 = vmul.f32 %v3273_v14, %v3268_v37  ;;  %v1281_v54 = vmax.f32 %v1217_v4, 0.0  ;;  %v3279_v37 = vld [vmem:[#allocation30_spill] sm:$0xff] }
  0xf7   : > { %v1285_v44 = vmax.f32 %v1221_v46, 0.0  ;;  %v1278_v24 = vmax.f32 %v1214_v45, 0.0  ;;  %v1282_v3 = vmax.f32 %v1218_v40, 0.0  ;;  %v1280_v53 = vmax.f32 %v1216_v23, 0.0  ;;  %v2675_v45 = vpop.permute.xlu0 %1163  ;;  %v3278_v23 = vld [vmem:[#allocation28_spill] sm:$0xff] }
  0xf8   : > { %v1742_v16 = vpack.c.bf16 %v1283_v60, %v1279_v18  ;;  %v2656_v58 = vmul.f32 %v3262_v17, %v3266_v41  ;;  %v382_v33 = vmul.f32 %v2269_v27, %v3274_v19  ;;  %v1284_v32 = vmax.f32 %v1220_v6, 0.0  ;;  %3277 = vst [vmem:[#allocation49_spill] sm:$0xff] %v2675_v45  ;;  %v1122_v18 = vld [vmem:[%s3134_s2 + $0x60] sm:$0xff] }
  0xf9   : > { %v2647_v30 = vpop.permute.xlu1 %683  ;;  %v1774_v11 = vpack.c.bf16 %v1285_v44, %v1281_v54  ;;  %v383_v29 = vmul.f32 %v3275_v10, %v3274_v19  ;;  %v384_v40 = vmul.f32 %v2273_v42, %v3274_v19  ;;  %v1744_v26 = vpack.c.bf16 %v1282_v3, %v1278_v24 }
  0xfa   : > { %3271 = vst [vmem:[#allocation40_spill] sm:$0xff] %v2647_v30  ;;  %1887 = vset.pattern.permute.xlu1 %v3249_v21  ;;  %v385_v21 = vmul.f32 %v3276_v1, %v3274_v19  ;;  %1743 = vmatprep.subr.bf16.mxu0 %v1742_v16  ;;  %v2669_v7 = vmul.f32 %v3263_v35, %v3266_v41 }
  0xfb   : > { %943 = vperm.xlu1 %1887, %v3260_v49   ;;  %v2673_v59 = vmul.f32 %v3264_v22, %v3266_v41  ;;  %v610_v8 = vadd.f32 %v546_v51, %v382_v33  ;;  %1775 = vmatprep.subr.bf16.mxu1 %v1774_v11  ;;  %v1776_v28 = vpack.c.bf16 %v1284_v32, %v1280_v53  ;;  %v307_v53 = vpop.permute.xlu0 %306 }
  0xfc   : > { %v611_v4 = vadd.f32 %v547_v12, %v383_v29  ;;  %v612_v61 = vadd.f32 %v548_v36, %v384_v40  ;;  %v613_v13 = vadd.f32 %v549_v50, %v385_v21  ;;  %v2679_v49 = vmul.f32 %v2288_v55, %v3278_v23  ;;  %1745 = vmatpush1.bf16.msra.mxu0 %v1744_v26  ;;  %v3280_v12 = vld [vmem:[#allocation43_spill] sm:$0xff] }
  0xfd   : > { %v2686_v62 = vmul.f32 %v2290_v52, %v3278_v23  ;;  %v2690_v6 = vmul.f32 %v2292_v56, %v3278_v23  ;;  %v2694_v41 = vmul.f32 %v2294_v57, %v3278_v23  ;;  %v2698_v51 = vmul.f32 %v2288_v55, %v3279_v37  ;;  %1777 = vmatpush1.bf16.msra.mxu1 %v1776_v28  ;;  %v1124_v29 = vld [vmem:[%s3134_s2 + $0x70] sm:$0xff] }
  0xfe   : > { %v292_v46 = vpop.permute.xlu1 %291  ;;  %v774_v60 = vmul.f32 %v3267_v34, %v3280_v12  ;;  %v775_v36 = vmul.f32 %v3262_v17, %v3280_v12  ;;  %v776_v50 = vmul.f32 %v3263_v35, %v3280_v12  ;;  %v777_v54 = vmul.f32 %v3264_v22, %v3280_v12  ;;  %v3292_v34 = vld [vmem:[#allocation42_spill] sm:$0xff] }
  0xff   : > { %1888 = vset.pattern.permute.xlu1 %v3239_v0  ;;  %v394_v44 = vmul.f32 %v2269_v27, %v2617_v47  ;;  %v395_v16 = vmul.f32 %v3275_v10, %v2617_v47  ;;  %v396_v24 = vmul.f32 %v2273_v42, %v2617_v47  ;;  %v397_v3 = vmul.f32 %v3276_v1, %v2617_v47 }
 0x100   : > { %1188 = vperm.xlu1 %1888, %v1122_v18   ;;  %v398_v19 = vmul.f32 %v2269_v27, %v292_v46  ;;  %v399_v33 = vmul.f32 %v3275_v10, %v292_v46  ;;  %v400_v0 = vmul.f32 %v2273_v42, %v292_v46  ;;  %v401_v11 = vmul.f32 %v3276_v1, %v292_v46 }
 0x101   : > { %v410_v28 = vmul.f32 %v2269_v27, %v307_v53  ;;  %v411_v23 = vmul.f32 %v3275_v10, %v307_v53  ;;  %v412_v18 = vmul.f32 %v2273_v42, %v307_v53  ;;  %v413_v46 = vmul.f32 %v3276_v1, %v307_v53  ;;  %v1125_v53 = vld [vmem:[%s3134_s2 + $0x78] sm:$0xff] }
 0x102   : > { %v1032_v22 = vmul.f32 %v2292_v56, %v3279_v37  ;;  %v838_v35 = vadd.f32 %v774_v60, %v610_v8  ;;  %v1002_v17 = vmul.f32 %v2288_v55, %v2593_v43  ;;  %v3290_v8 = vld [vmem:[#allocation38_spill] sm:$0xff]  ;;  %v1033_v48 = vmul.f32 %v2294_v57, %v3279_v37 }
 0x103   : > { %v464_v32 = vpop.permute.xlu1 %463  ;;  %v639_v60 = vadd.f32 %v3290_v8, %v411_v23  ;;  %v641_v30 = vadd.f32 %v3292_v34, %v413_v46  ;;  %v3296_v46 = vld [vmem:[#allocation26_spill] sm:$0xff] }
 0x104   : > { %v562_v40 = vmul.f32 %v3269_v25, %v464_v32  ;;  %v563_v21 = vmul.f32 %v3270_v2, %v464_v32  ;;  %v564_v47 = vmul.f32 %v3272_v63, %v464_v32  ;;  %v565_v26 = vmul.f32 %v3273_v14, %v464_v32  ;;  %1198 = vperm.xlu1 %1888, %v1124_v29  }
 0x105   : > { %v1031_v32 = vmul.f32 %v2290_v52, %v3279_v37 }
 0x106   : > { %v2732_v12 = vadd.f32 %v562_v40, %v398_v19  ;;  %v2734_v31 = vadd.f32 %v563_v21, %v399_v33  ;;  %v2736_v45 = vadd.f32 %v564_v47, %v400_v0  ;;  %v2738_v20 = vadd.f32 %v565_v26, %v401_v11  ;;  %v3285_v19 = vld [vmem:[#allocation32_spill] sm:$0xff]  ;;  %v3286_v0 = vld [vmem:[#allocation33_spill] sm:$0xff]  ;;  %v3287_v40 = vld [vmem:[#allocation35_spill] sm:$0xff] }
 0x107   : > { %v622_v33 = vadd.f32 %v3285_v19, %v394_v44  ;;  %v623_v11 = vadd.f32 %v3286_v0, %v395_v16  ;;  %v624_v29 = vadd.f32 %v3287_v40, %v396_v24  ;;  %v3288_v21 = vld [vmem:[#allocation36_spill] sm:$0xff]  ;;  %v839_v44 = vadd.f32 %v775_v36, %v611_v4 }
 0x108   : > { %3281 = vst [vmem:[#allocation31_spill] sm:$0xff] %v2732_v12  ;;  %3282 = vst [vmem:[#allocation46_spill] sm:$0xff] %v2734_v31  ;;  %v625_v47 = vadd.f32 %v3288_v21, %v397_v3  ;;  %v2753_v26 = vpop.permute.xlu1 %907  ;;  %v3291_v31 = vld [vmem:[#allocation41_spill] sm:$0xff]  ;;  %v840_v19 = vadd.f32 %v776_v50, %v612_v61  ;;  %v841_v16 = vadd.f32 %v777_v54, %v613_v13  ;;  %1203 = vperm.xlu1 %1888, %v1125_v53  }
 0x109   : > { %3283 = vst [vmem:[#allocation47_spill] sm:$0xff] %v2736_v45  ;;  %3284 = vst [vmem:[#allocation5_spill] sm:$0xff] %v2738_v20  ;;  %v3289_v20 = vld [vmem:[#allocation37_spill] sm:$0xff]  ;;  %v640_v12 = vadd.f32 %v3291_v31, %v412_v18  ;;  %v1003_v24 = vmul.f32 %v2290_v52, %v2593_v43  ;;  %v1004_v3 = vmul.f32 %v2292_v56, %v2593_v43  ;;  %v3294_v18 = vld [vmem:[#allocation24_spill] sm:$0xff] }
 0x10a   : > { %v638_v45 = vadd.f32 %v3289_v20, %v410_v28  ;;  %v1005_v20 = vmul.f32 %v2294_v57, %v2593_v43  ;;  %v1066_v28 = vadd.f32 %v1002_v17, %v838_v35  ;;  %v3293_v31 = vld [vmem:[#allocation45_spill] sm:$0xff]  ;;  %v851_v34 = vadd.f32 %v2627_v38, %v623_v11  ;;  %v3297_v38 = vld [vmem:[#allocation27_spill] sm:$0xff] }
 0x10b   : > { %v850_v23 = vadd.f32 %v3293_v31, %v622_v33  ;;  %v852_v37 = vadd.f32 %v2631_v9, %v624_v29  ;;  %v853_v4 = vadd.f32 %v2635_v39, %v625_v47  ;;  %v867_v36 = vadd.f32 %v2656_v58, %v639_v60  ;;  %v3295_v17 = vld [vmem:[#allocation25_spill] sm:$0xff] }
 0x10c   : > { %v866_v13 = vadd.f32 %v2641_v15, %v638_v45  ;;  %v868_v50 = vadd.f32 %v2669_v7, %v640_v12  ;;  %v869_v54 = vadd.f32 %v2673_v59, %v641_v30  ;;  %v2783_v39 = vadd.f32 %v2686_v62, %v851_v34 }
 0x10d   : > { %v1149_v61 = vpop.permute.xlu1 %1148  ;;  %v2780_v9 = vadd.f32 %v2679_v49, %v850_v23  ;;  %v2786_v15 = vadd.f32 %v2690_v6, %v852_v37  ;;  %v2789_v58 = vadd.f32 %v2694_v41, %v853_v4  ;;  %v1067_v30 = vadd.f32 %v1003_v24, %v839_v44  ;;  %v3303_v37 = vld [vmem:[#allocation44_spill] sm:$0xff] }
 0x10e   : > { %v1222_v43 = vadd.f32 %v1149_v61, %v3294_v18  ;;  %v1223_v35 = vadd.f32 %v1149_v61, %v3295_v17  ;;  %v1224_v53 = vadd.f32 %v1149_v61, %v3296_v46  ;;  %v1225_v33 = vadd.f32 %v1149_v61, %v3297_v38 }
 0x10f   : > { %v1068_v7 = vadd.f32 %v1004_v3, %v840_v19  ;;  %v1069_v59 = vadd.f32 %v1005_v20, %v841_v16  ;;  %v2792_v0 = vadd.f32 %v2698_v51, %v866_v13  ;;  %v2794_v11 = vadd.f32 %v1031_v32, %v867_v36  ;;  %v3302_v20 = vld [vmem:[#allocation22_spill] sm:$0xff] }
 0x110   : > { %v1287_v45 = vmax.f32 %v1223_v35, 0.0  ;;  %v2796_v49 = vadd.f32 %v1032_v22, %v868_v50  ;;  %v2798_v62 = vadd.f32 %v1033_v48, %v869_v54  ;;  %v1289_v41 = vmax.f32 %v1225_v33, 0.0  ;;  %v3304_v54 = vld [vmem:[#allocation50_spill] sm:$0xff] }
 0x111   : > { %v1154_v12 = vpop.permute.xlu1 %1153  ;;  %3298 = vst [vmem:[#allocation6_spill] sm:$0xff] %v2792_v0  ;;  %3299 = vst [vmem:[#allocation8_spill] sm:$0xff] %v2794_v11  ;;  %v1286_v47 = vmax.f32 %v1222_v43, 0.0  ;;  %v1288_v8 = vmax.f32 %v1224_v53, 0.0  ;;  %v1981_v24 = vmov 0.0   ;;  %v1011_v31 = vmul.f32 %v2290_v52, %v3302_v20 }
 0x112   : > { %3300 = vst [vmem:[#allocation9_spill] sm:$0xff] %v2796_v49  ;;  %3301 = vst [vmem:[#allocation23_spill] sm:$0xff] %v2798_v62  ;;  %v1226_v40 = vadd.f32 %v1154_v12, %v1066_v28  ;;  %v1227_v6 = vadd.f32 %v1154_v12, %v1067_v30  ;;  %v1228_v29 = vadd.f32 %v1154_v12, %v1068_v7  ;;  %1405 = vmatprep.mubr.f32.mxu0 %v1981_v24  ;;  %v3305_v30 = vld [vmem:[#allocation51_spill] sm:$0xff] }
 0x113   : > { %v1229_v21 = vadd.f32 %v1154_v12, %v1069_v59  ;;  %1476 = vmatprep.mubr.f32.mxu1 %v1981_v24  ;;  %v1010_v28 = vmul.f32 %v2288_v55, %v3302_v20  ;;  %v1012_v23 = vmul.f32 %v2292_v56, %v3302_v20  ;;  %v1013_v34 = vmul.f32 %v2294_v57, %v3302_v20 }
 0x114   : > { %v1291_v60 = vmax.f32 %v1227_v6, 0.0  ;;  %v1290_v19 = vmax.f32 %v1226_v40, 0.0  ;;  %v1292_v16 = vmax.f32 %v1228_v29, 0.0  ;;  %v386_v4 = vmul.f32 %v2269_v27, %v3303_v37  ;;  %v3306_v40 = vld [vmem:[#allocation40_spill] sm:$0xff]  ;;  %v3307_v6 = vld [vmem:[#allocation14_spill] sm:$0xff] }
 0x115   : > { %v1293_v44 = vmax.f32 %v1229_v21, 0.0  ;;  %v387_v61 = vmul.f32 %v3275_v10, %v3303_v37  ;;  %v388_v13 = vmul.f32 %v2273_v42, %v3303_v37  ;;  %v389_v36 = vmul.f32 %v3276_v1, %v3303_v37  ;;  %v3308_v21 = vld [vmem:[#allocation16_spill] sm:$0xff] }
 0x116   : > { %v2800_v51 = vpop.permute.xlu1 %691  ;;  %v1746_v22 = vpack.c.bf16 %v1291_v60, %v1287_v45  ;;  %v1748_v48 = vpack.c.bf16 %v1290_v19, %v1286_v47  ;;  %v1780_v3 = vpack.c.bf16 %v1292_v16, %v1288_v8  ;;  %v550_v18 = vmul.f32 %v3269_v25, %v3304_v54  ;;  %v3310_v8 = vld [vmem:[#allocation17_spill] sm:$0xff] }
 0x117   : > { %v1778_v32 = vpack.c.bf16 %v1293_v44, %v1289_v41  ;;  %v551_v43 = vmul.f32 %v3270_v2, %v3304_v54  ;;  %v552_v17 = vmul.f32 %v3272_v63, %v3304_v54  ;;  %v553_v35 = vmul.f32 %v3273_v14, %v3304_v54 }
 0x118   : > { %1747 = vmatprep.subr.bf16.mxu0 %v1746_v22  ;;  %v390_v46 = vmul.f32 %v2269_v27, %v2578_v5  ;;  %v391_v53 = vmul.f32 %v3275_v10, %v2578_v5  ;;  %v392_v38 = vmul.f32 %v2273_v42, %v2578_v5  ;;  %v393_v33 = vmul.f32 %v3276_v1, %v2578_v5  ;;  %v3309_v5 = vld [vmem:[#allocation15_spill] sm:$0xff] }
 0x119   : > { %1779 = vmatprep.subr.bf16.mxu1 %v1778_v32  ;;  %1749 = vmatpush1.bf16.msra.mxu0 %v1748_v48  ;;  %v554_v7 = vmul.f32 %v3269_v25, %v3305_v30  ;;  %v555_v59 = vmul.f32 %v3270_v2, %v3305_v30  ;;  %v556_v45 = vmul.f32 %v3272_v63, %v3305_v30 }
 0x11a   : > { %1781 = vmatpush1.bf16.msra.mxu1 %v1780_v3  ;;  %v557_v12 = vmul.f32 %v3273_v14, %v3305_v30  ;;  %v782_v29 = vmul.f32 %v3307_v6, %v3306_v40  ;;  %v783_v41 = vmul.f32 %v3308_v21, %v3306_v40  ;;  %v784_v47 = vmul.f32 %v3309_v5, %v3306_v40 }
 0x11b   : > { %v297_v50 = vpop.permute.xlu1 %296  ;;  %v785_v60 = vmul.f32 %v3310_v8, %v3306_v40  ;;  %v618_v37 = vadd.f32 %v554_v7, %v390_v46  ;;  %v619_v54 = vadd.f32 %v555_v59, %v391_v53  ;;  %v620_v30 = vadd.f32 %v556_v45, %v392_v38  ;;  %v3311_v38 = vld [vmem:[#allocation39_spill] sm:$0xff] }
 0x11c   : > { %v402_v44 = vmul.f32 %v2269_v27, %v297_v50  ;;  %v403_v19 = vmul.f32 %v3275_v10, %v297_v50  ;;  %v404_v16 = vmul.f32 %v2273_v42, %v297_v50  ;;  %v405_v24 = vmul.f32 %v3276_v1, %v297_v50 }
 0x11d   : > { %v621_v40 = vadd.f32 %v557_v12, %v393_v33  ;;  %v846_v0 = vadd.f32 %v782_v29, %v618_v37  ;;  %v848_v1 = vadd.f32 %v784_v47, %v620_v30  ;;  %v614_v27 = vadd.f32 %v550_v18, %v386_v4 }
 0x11e   : > { %v616_v46 = vadd.f32 %v552_v17, %v388_v13  ;;  %v617_v53 = vadd.f32 %v553_v35, %v389_v36  ;;  %v778_v33 = vmul.f32 %v3307_v6, %v3311_v38  ;;  %v779_v7 = vmul.f32 %v3308_v21, %v3311_v38 }
 0x11f   : > { %v780_v59 = vmul.f32 %v3309_v5, %v3311_v38  ;;  %v781_v45 = vmul.f32 %v3310_v8, %v3311_v38  ;;  %v1074_v12 = vadd.f32 %v1010_v28, %v846_v0  ;;  %v1006_v4 = vmul.f32 %v2288_v55, %v2753_v26 }
 0x120   : > { %v468_v22 = vpop.permute.xlu1 %467  ;;  %v1008_v13 = vmul.f32 %v2292_v56, %v2753_v26  ;;  %v1009_v36 = vmul.f32 %v2294_v57, %v2753_v26 }
 0x121   : > { %v566_v32 = vmul.f32 %v3269_v25, %v468_v22  ;;  %v567_v48 = vmul.f32 %v3270_v2, %v468_v22  ;;  %v568_v3 = vmul.f32 %v3272_v63, %v468_v22  ;;  %v569_v20 = vmul.f32 %v3273_v14, %v468_v22 }
 0x122   : > { %v847_v25 = vadd.f32 %v783_v41, %v619_v54  ;;  %v849_v2 = vadd.f32 %v785_v60, %v621_v40  ;;  %v615_v22 = vadd.f32 %v551_v43, %v387_v61  ;;  %v1076_v41 = vadd.f32 %v1012_v23, %v848_v1 }
 0x123   : > { %v2858_v62 = vadd.f32 %v566_v32, %v402_v44  ;;  %v2860_v49 = vadd.f32 %v567_v48, %v403_v19  ;;  %v2862_v11 = vadd.f32 %v568_v3, %v404_v16  ;;  %v2864_v50 = vadd.f32 %v569_v20, %v405_v24 }
 0x124   : > { %v2866_v10 = vpop.permute.xlu1 %471  ;;  %v1075_v29 = vadd.f32 %v1011_v31, %v847_v25  ;;  %v1077_v47 = vadd.f32 %v1013_v34, %v849_v2  ;;  %v1007_v61 = vmul.f32 %v2290_v52, %v2753_v26  ;;  %v842_v43 = vadd.f32 %v778_v33, %v614_v27  ;;  %v3312_v25 = vld [vmem:[#allocation49_spill] sm:$0xff] }
 0x125   : > { %v843_v17 = vadd.f32 %v779_v7, %v615_v22  ;;  %v844_v35 = vadd.f32 %v780_v59, %v616_v46  ;;  %v845_v0 = vadd.f32 %v781_v45, %v617_v53  ;;  %v1234_v1 = vadd.f32 %v3312_v25, %v1074_v12  ;;  %v3313_v7 = vld [vmem:[#allocation48_spill] sm:$0xff] }
 0x126   : > { %v1235_v2 = vadd.f32 %v3312_v25, %v1075_v29  ;;  %v1236_v28 = vadd.f32 %v3312_v25, %v1076_v41  ;;  %v1237_v31 = vadd.f32 %v3312_v25, %v1077_v47  ;;  %v1070_v23 = vadd.f32 %v1006_v4, %v842_v43  ;;  %v3314_v47 = vld [vmem:[#allocation29_spill] sm:$0xff] }
 0x127   : > { %v1071_v34 = vadd.f32 %v1007_v61, %v843_v17  ;;  %v1072_v60 = vadd.f32 %v1008_v13, %v844_v35  ;;  %v1073_v44 = vadd.f32 %v1009_v36, %v845_v0  ;;  %v1298_v3 = vmax.f32 %v1234_v1, 0.0 }
 0x128   : > { %v1299_v32 = vmax.f32 %v1235_v2, 0.0  ;;  %v1301_v48 = vmax.f32 %v1237_v31, 0.0  ;;  %v1300_v20 = vmax.f32 %v1236_v28, 0.0  ;;  %v408_v59 = vmul.f32 %v2273_v42, %v3313_v7 }
 0x129   : > { %v920_v18 = vpop.permute.xlu1 %919  ;;  %v572_v45 = vmul.f32 %v3272_v63, %v2866_v10  ;;  %v1028_v4 = vmul.f32 %v2292_v56, %v3314_v47  ;;  %v790_v35 = vmul.f32 %v3307_v6, %v2800_v51  ;;  %v791_v0 = vmul.f32 %v3308_v21, %v2800_v51 }
 0x12a   : > { %v792_v25 = vmul.f32 %v3309_v5, %v2800_v51  ;;  %v793_v1 = vmul.f32 %v3310_v8, %v2800_v51  ;;  %v1018_v2 = vmul.f32 %v2288_v55, %v920_v18  ;;  %v1019_v28 = vmul.f32 %v2290_v52, %v920_v18 }
 0x12b   : > { %v636_v29 = vadd.f32 %v572_v45, %v408_v59  ;;  %v1020_v31 = vmul.f32 %v2292_v56, %v920_v18 }
 0x12e   : > { %v1159_v19 = vpop.permute.xlu1 %1158 }
 0x12f   : > { %v1230_v16 = vadd.f32 %v1159_v19, %v1070_v23  ;;  %v1231_v26 = vadd.f32 %v1159_v19, %v1071_v34  ;;  %v1232_v24 = vadd.f32 %v1159_v19, %v1072_v60  ;;  %v1233_v27 = vadd.f32 %v1159_v19, %v1073_v44  ;;  %v3315_v60 = vld [vmem:[#allocation31_spill] sm:$0xff]  ;;  %v3316_v19 = vld [vmem:[#allocation46_spill] sm:$0xff] }
 0x130   : > { %v1021_v23 = vmul.f32 %v2294_v57, %v920_v18  ;;  %v854_v44 = vadd.f32 %v790_v35, %v3315_v60 }
 0x131   : > { %v1295_v37 = vmax.f32 %v1231_v26, 0.0  ;;  %v1297_v54 = vmax.f32 %v1233_v27, 0.0  ;;  %v1294_v30 = vmax.f32 %v1230_v16, 0.0  ;;  %v1296_v40 = vmax.f32 %v1232_v24, 0.0  ;;  %v3317_v26 = vld [vmem:[#allocation47_spill] sm:$0xff]  ;;  %v3318_v27 = vld [vmem:[#allocation5_spill] sm:$0xff] }
 0x132   : > { %v855_v16 = vadd.f32 %v791_v0, %v3316_v19  ;;  %v856_v24 = vadd.f32 %v792_v25, %v3317_v26 }
 0x133   : > { %v2888_v22 = vpop.permute.xlu1 %695  ;;  %v1750_v46 = vpack.c.bf16 %v1299_v32, %v1295_v37  ;;  %v1782_v53 = vpack.c.bf16 %v1301_v48, %v1297_v54  ;;  %v1752_v38 = vpack.c.bf16 %v1298_v3, %v1294_v30  ;;  %v1784_v33 = vpack.c.bf16 %v1300_v20, %v1296_v40 }
 0x134   : > { %v857_v32 = vadd.f32 %v793_v1, %v3318_v27  ;;  %v1082_v37 = vadd.f32 %v1018_v2, %v854_v44  ;;  %v1083_v54 = vadd.f32 %v1019_v28, %v855_v16  ;;  %v1084_v18 = vadd.f32 %v1020_v31, %v856_v24  ;;  %v3319_v1 = vld [vmem:[#allocation18_spill] sm:$0xff]  ;;  %v3320_v28 = vld [vmem:[#allocation19_spill] sm:$0xff] }
 0x135   : > { %1751 = vmatprep.subr.bf16.mxu0 %v1750_v46  ;;  %1783 = vmatprep.subr.bf16.mxu1 %v1782_v53  ;;  %v406_v2 = vmul.f32 %v3319_v1, %v3313_v7  ;;  %v407_v31 = vmul.f32 %v3320_v28, %v3313_v7  ;;  %v3322_v44 = vld [vmem:[#allocation10_spill] sm:$0xff]  ;;  %v3323_v16 = vld [vmem:[#allocation11_spill] sm:$0xff]  ;;  %v573_v24 = vmul.f32 %v3273_v14, %v2866_v10 }
 0x136   : > { %1753 = vmatpush1.bf16.msra.mxu0 %v1752_v38  ;;  %1785 = vmatpush1.bf16.msra.mxu1 %v1784_v33  ;;  %v1085_v30 = vadd.f32 %v1021_v23, %v857_v32  ;;  %v570_v19 = vmul.f32 %v3322_v44, %v2866_v10  ;;  %v571_v26 = vmul.f32 %v3323_v16, %v2866_v10 }
 0x137   : > { %v700_v12 = vpop.permute.xlu1 %699  ;;  %v1027_v10 = vmul.f32 %v2290_v52, %v3314_v47 }
 0x138   : > { %v800_v41 = vmul.f32 %v3309_v5, %v700_v12  ;;  %v798_v27 = vmul.f32 %v3307_v6, %v700_v12  ;;  %v799_v32 = vmul.f32 %v3308_v21, %v700_v12 }
 0x13a   : > { %v864_v61 = vadd.f32 %v800_v41, %v636_v29 }
 0x13c   : > { %v2897_v13 = vpop.permute.xlu1 %311  ;;  %v2899_v36 = vadd.f32 %v1028_v4, %v864_v61 }
 0x141   : > { %v2901_v43 = vpop.permute.xlu1 %479 }
 0x146   : > { %v2903_v17 = vpop.permute.xlu1 %923 }
 0x14b   : > { %v1169_v34 = vpop.permute.xlu1 %1168 }
 0x14c   : > { %v1238_v48 = vadd.f32 %v1169_v34, %v2780_v9  ;;  %v1239_v51 = vadd.f32 %v1169_v34, %v2783_v39  ;;  %v1240_v3 = vadd.f32 %v1169_v34, %v2786_v15  ;;  %v1241_v20 = vadd.f32 %v1169_v34, %v2789_v58  ;;  %v3321_v34 = vld [vmem:[#allocation20_spill] sm:$0xff] }
 0x14d   : > { %v409_v60 = vmul.f32 %v3321_v34, %v3313_v7  ;;  %v322_v7 = vpop.permute.xlu0 %321 }
 0x14e   : > { %v1303_v59 = vmax.f32 %v1239_v51, 0.0  ;;  %v1305_v45 = vmax.f32 %v1241_v20, 0.0  ;;  %v1302_v29 = vmax.f32 %v1238_v48, 0.0  ;;  %v1304_v41 = vmax.f32 %v1240_v3, 0.0 }
 0x14f   : > { %v1174_v40 = vpop.permute.xlu1 %1173  ;;  %v801_v48 = vmul.f32 %v3310_v8, %v700_v12  ;;  %v634_v51 = vadd.f32 %v570_v19, %v406_v2  ;;  %v635_v3 = vadd.f32 %v571_v26, %v407_v31  ;;  %v637_v20 = vadd.f32 %v573_v24, %v409_v60 }
 0x150   : > { %v1242_v46 = vadd.f32 %v1174_v40, %v1082_v37  ;;  %v1243_v53 = vadd.f32 %v1174_v40, %v1083_v54  ;;  %v1244_v38 = vadd.f32 %v1174_v40, %v1084_v18  ;;  %v1245_v33 = vadd.f32 %v1174_v40, %v1085_v30 }
 0x151   : > { %v862_v54 = vadd.f32 %v798_v27, %v634_v51  ;;  %v863_v18 = vadd.f32 %v799_v32, %v635_v3  ;;  %v865_v30 = vadd.f32 %v801_v48, %v637_v20  ;;  %v1026_v40 = vmul.f32 %v2288_v55, %v3314_v47 }
 0x152   : > { %v1307_v9 = vmax.f32 %v1243_v53, 0.0  ;;  %v1309_v4 = vmax.f32 %v1245_v33, 0.0  ;;  %v1306_v39 = vmax.f32 %v1242_v46, 0.0  ;;  %v1308_v61 = vmax.f32 %v1244_v38, 0.0 }
 0x153   : > { %v1029_v46 = vmul.f32 %v2294_v57, %v3314_v47  ;;  %v794_v12 = vmul.f32 %v3307_v6, %v2888_v22  ;;  %v1090_v38 = vadd.f32 %v1026_v40, %v862_v54  ;;  %v1091_v33 = vadd.f32 %v1027_v10, %v863_v18  ;;  %v1184_v47 = vpop.permute.xlu0 %1183 }
 0x154   : > { %v2925_v15 = vpop.permute.xlu1 %707  ;;  %v1754_v58 = vpack.c.bf16 %v1307_v9, %v1303_v59  ;;  %v1786_v35 = vpack.c.bf16 %v1309_v4, %v1305_v45  ;;  %v1756_v0 = vpack.c.bf16 %v1306_v39, %v1302_v29  ;;  %v1788_v25 = vpack.c.bf16 %v1308_v61, %v1304_v41 }
 0x155   : > { %v1093_v59 = vadd.f32 %v1029_v46, %v865_v30  ;;  %v795_v45 = vmul.f32 %v3308_v21, %v2888_v22  ;;  %v796_v29 = vmul.f32 %v3309_v5, %v2888_v22  ;;  %v797_v41 = vmul.f32 %v3310_v8, %v2888_v22 }
 0x156   : > { %1755 = vmatprep.subr.bf16.mxu0 %v1754_v58  ;;  %1787 = vmatprep.subr.bf16.mxu1 %v1786_v35  ;;  %v2963_v9 = vmul.f32 %v3319_v1, %v322_v7  ;;  %v858_v4 = vadd.f32 %v794_v12, %v2858_v62  ;;  %v2967_v39 = vmul.f32 %v3320_v28, %v322_v7 }
 0x157   : > { %1757 = vmatpush1.bf16.msra.mxu0 %v1756_v0  ;;  %1789 = vmatpush1.bf16.msra.mxu1 %v1788_v25  ;;  %v2970_v61 = vmul.f32 %v2273_v42, %v322_v7  ;;  %v2973_v58 = vmul.f32 %v3321_v34, %v322_v7  ;;  %v1022_v35 = vmul.f32 %v2288_v55, %v2903_v17 }
 0x158   : > { %v1023_v22 = vmul.f32 %v2290_v52, %v2903_v17  ;;  %v1024_v0 = vmul.f32 %v2292_v56, %v2903_v17  ;;  %v1025_v62 = vmul.f32 %v2294_v57, %v2903_v17  ;;  %v1250_v2 = vadd.f32 %v1184_v47, %v1090_v38 }
 0x159   : > { %v2931_v23 = vpop.permute.xlu1 %316  ;;  %v1251_v31 = vadd.f32 %v1184_v47, %v1091_v33  ;;  %v1252_v60 = vadd.f32 %v1184_v47, %v2899_v36  ;;  %v1253_v19 = vadd.f32 %v1184_v47, %v1093_v59  ;;  %v859_v26 = vadd.f32 %v795_v45, %v2860_v49 }
 0x15a   : > { %v860_v24 = vadd.f32 %v796_v29, %v2862_v11  ;;  %v861_v27 = vadd.f32 %v797_v41, %v2864_v50  ;;  %v414_v32 = vmul.f32 %v3319_v1, %v2897_v13  ;;  %v415_v48 = vmul.f32 %v3320_v28, %v2897_v13 }
 0x15b   : > { %v416_v17 = vmul.f32 %v2273_v42, %v2897_v13  ;;  %v417_v51 = vmul.f32 %v3321_v34, %v2897_v13  ;;  %v578_v36 = vmul.f32 %v3322_v44, %v2901_v43  ;;  %v1086_v49 = vadd.f32 %v1022_v35, %v858_v4 }
 0x15c   : > { %v1087_v3 = vadd.f32 %v1023_v22, %v859_v26  ;;  %v1088_v11 = vadd.f32 %v1024_v0, %v860_v24  ;;  %v1089_v20 = vadd.f32 %v1025_v62, %v861_v27  ;;  %v1315_v7 = vmax.f32 %v1251_v31, 0.0 }
 0x15d   : > { %v1317_v54 = vmax.f32 %v1253_v19, 0.0  ;;  %v1314_v18 = vmax.f32 %v1250_v2, 0.0  ;;  %v1316_v30 = vmax.f32 %v1252_v60, 0.0  ;;  %v579_v38 = vmul.f32 %v3323_v16, %v2901_v43 }
 0x15e   : > { %v2944_v37 = vpop.permute.xlu1 %483  ;;  %v580_v13 = vmul.f32 %v3272_v63, %v2901_v43  ;;  %v581_v33 = vmul.f32 %v3273_v14, %v2901_v43  ;;  %v642_v59 = vadd.f32 %v578_v36, %v414_v32  ;;  %v806_v4 = vmul.f32 %v3307_v6, %v2925_v15 }
 0x15f   : > { %v807_v35 = vmul.f32 %v3308_v21, %v2925_v15  ;;  %v808_v22 = vmul.f32 %v3309_v5, %v2925_v15  ;;  %v809_v0 = vmul.f32 %v3310_v8, %v2925_v15  ;;  %v643_v19 = vadd.f32 %v579_v38, %v415_v48 }
 0x160   : > { %v644_v26 = vadd.f32 %v580_v13, %v416_v17  ;;  %v645_v24 = vadd.f32 %v581_v33, %v417_v51  ;;  %v582_v48 = vmul.f32 %v3322_v44, %v2944_v37  ;;  %v583_v17 = vmul.f32 %v3323_v16, %v2944_v37 }
 0x161   : > { %v871_v15 = vadd.f32 %v807_v35, %v643_v19  ;;  %v584_v51 = vmul.f32 %v3272_v63, %v2944_v37 }
 0x162   : > { %v2954_v53 = vpop.permute.xlu1 %487 }
 0x167   : > { %v936_v25 = vpop.permute.xlu1 %935 }
 0x168   : > { %v1034_v27 = vmul.f32 %v2288_v55, %v936_v25  ;;  %v1035_v32 = vmul.f32 %v2290_v52, %v936_v25  ;;  %v1036_v36 = vmul.f32 %v2292_v56, %v936_v25 }
 0x16c   : > { %v1179_v50 = vpop.permute.xlu1 %1178 }
 0x16d   : > { %v1246_v40 = vadd.f32 %v1179_v50, %v1086_v49  ;;  %v1247_v10 = vadd.f32 %v1179_v50, %v1087_v3  ;;  %v1248_v46 = vadd.f32 %v1179_v50, %v1088_v11  ;;  %v1249_v12 = vadd.f32 %v1179_v50, %v1089_v20 }
 0x16e   : > { %v1037_v49 = vmul.f32 %v2294_v57, %v936_v25  ;;  %v870_v3 = vadd.f32 %v806_v4, %v642_v59  ;;  %v872_v11 = vadd.f32 %v808_v22, %v644_v26  ;;  %v873_v20 = vadd.f32 %v809_v0, %v645_v24 }
 0x16f   : > { %v1311_v45 = vmax.f32 %v1247_v10, 0.0  ;;  %v1313_v29 = vmax.f32 %v1249_v12, 0.0  ;;  %v1310_v41 = vmax.f32 %v1246_v40, 0.0  ;;  %v1312_v47 = vmax.f32 %v1248_v46, 0.0 }
 0x170   : > { %v585_v50 = vmul.f32 %v3273_v14, %v2944_v37  ;;  %v418_v25 = vmul.f32 %v3319_v1, %v2931_v23  ;;  %v1098_v40 = vadd.f32 %v1034_v27, %v870_v3  ;;  %v1099_v10 = vadd.f32 %v1035_v32, %v871_v15 }
 0x171   : > { %v712_v62 = vpop.permute.xlu1 %711  ;;  %v1758_v2 = vpack.c.bf16 %v1315_v7, %v1311_v45  ;;  %v1790_v43 = vpack.c.bf16 %v1317_v54, %v1313_v29  ;;  %v1760_v31 = vpack.c.bf16 %v1314_v18, %v1310_v41  ;;  %v1792_v60 = vpack.c.bf16 %v1316_v30, %v1312_v47  ;;  %v1194_v45 = vpop.permute.xlu0 %1193 }
 0x172   : > { %v419_v7 = vmul.f32 %v3320_v28, %v2931_v23  ;;  %v420_v54 = vmul.f32 %v2273_v42, %v2931_v23  ;;  %v421_v18 = vmul.f32 %v3321_v34, %v2931_v23  ;;  %v1100_v46 = vadd.f32 %v1036_v36, %v872_v11 }
 0x173   : > { %1759 = vmatprep.subr.bf16.mxu0 %v1758_v2  ;;  %1791 = vmatprep.subr.bf16.mxu1 %v1790_v43  ;;  %v1101_v12 = vadd.f32 %v1037_v49, %v873_v20  ;;  %v810_v37 = vmul.f32 %v3307_v6, %v712_v62  ;;  %v811_v38 = vmul.f32 %v3308_v21, %v712_v62 }
 0x174   : > { %1761 = vmatpush1.bf16.msra.mxu0 %v1760_v31  ;;  %1793 = vmatpush1.bf16.msra.mxu1 %v1792_v60  ;;  %v812_v1 = vmul.f32 %v3309_v5, %v712_v62  ;;  %v813_v13 = vmul.f32 %v3310_v8, %v712_v62  ;;  %v646_v28 = vadd.f32 %v582_v48, %v418_v25  ;;  %v3324_v60 = vld [vmem:[#allocation34_spill] sm:$0xff] }
 0x175   : > { %v716_v30 = vpop.permute.xlu1 %715  ;;  %v647_v33 = vadd.f32 %v583_v17, %v419_v7  ;;  %v648_v59 = vadd.f32 %v584_v51, %v420_v54  ;;  %v649_v42 = vadd.f32 %v585_v50, %v421_v18  ;;  %v586_v23 = vmul.f32 %v3322_v44, %v2954_v53  ;;  %v3327_v7 = vld [vmem:[#allocation9_spill] sm:$0xff]  ;;  %v3328_v18 = vld [vmem:[#allocation23_spill] sm:$0xff] }
 0x176   : > { %v587_v34 = vmul.f32 %v3323_v16, %v2954_v53  ;;  %v588_v29 = vmul.f32 %v3272_v63, %v2954_v53  ;;  %v589_v41 = vmul.f32 %v3273_v14, %v2954_v53  ;;  %v1259_v4 = vadd.f32 %v1194_v45, %v1099_v10 }
 0x177   : > { %v1261_v35 = vadd.f32 %v1194_v45, %v1101_v12  ;;  %v1258_v22 = vadd.f32 %v1194_v45, %v1098_v40  ;;  %v1260_v0 = vadd.f32 %v1194_v45, %v1100_v46  ;;  %v874_v62 = vadd.f32 %v810_v37, %v646_v28 }
 0x178   : > { %v875_v2 = vadd.f32 %v811_v38, %v647_v33  ;;  %v876_v43 = vadd.f32 %v812_v1, %v648_v59  ;;  %v877_v31 = vadd.f32 %v813_v13, %v649_v42  ;;  %v1038_v44 = vmul.f32 %v2288_v55, %v3324_v60 }
 0x179   : > { %v1039_v16 = vmul.f32 %v2290_v52, %v3324_v60  ;;  %v1040_v63 = vmul.f32 %v2292_v56, %v3324_v60  ;;  %v1041_v14 = vmul.f32 %v2294_v57, %v3324_v60  ;;  %v650_v53 = vadd.f32 %v586_v23, %v2963_v9 }
 0x17a   : > { %v944_v47 = vpop.permute.xlu1 %943  ;;  %v651_v19 = vadd.f32 %v587_v34, %v2967_v39  ;;  %v652_v26 = vadd.f32 %v588_v29, %v2970_v61  ;;  %v653_v24 = vadd.f32 %v589_v41, %v2973_v58  ;;  %v1323_v27 = vmax.f32 %v1259_v4, 0.0  ;;  %v3325_v61 = vld [vmem:[#allocation6_spill] sm:$0xff]  ;;  %v3326_v58 = vld [vmem:[#allocation8_spill] sm:$0xff] }
 0x17b   : > { %v1325_v32 = vmax.f32 %v1261_v35, 0.0  ;;  %v1322_v36 = vmax.f32 %v1258_v22, 0.0  ;;  %v1324_v49 = vmax.f32 %v1260_v0, 0.0  ;;  %v1102_v3 = vadd.f32 %v1038_v44, %v874_v62 }
 0x17c   : > { %v1103_v15 = vadd.f32 %v1039_v16, %v875_v2  ;;  %v1104_v11 = vadd.f32 %v1040_v63, %v876_v43  ;;  %v1105_v20 = vadd.f32 %v1041_v14, %v877_v31  ;;  %v814_v48 = vmul.f32 %v3307_v6, %v716_v30 }
 0x17d   : > { %v815_v17 = vmul.f32 %v3308_v21, %v716_v30  ;;  %v816_v9 = vmul.f32 %v3309_v5, %v716_v30  ;;  %v817_v39 = vmul.f32 %v3310_v8, %v716_v30  ;;  %v1042_v10 = vmul.f32 %v2288_v55, %v944_v47 }
 0x17e   : > { %v1043_v46 = vmul.f32 %v2290_v52, %v944_v47  ;;  %v1044_v6 = vmul.f32 %v2292_v56, %v944_v47  ;;  %v1045_v21 = vmul.f32 %v2294_v57, %v944_v47  ;;  %v878_v38 = vadd.f32 %v814_v48, %v650_v53 }
 0x17f   : > { %v1189_v51 = vpop.permute.xlu1 %1188  ;;  %v879_v1 = vadd.f32 %v815_v17, %v651_v19  ;;  %v880_v13 = vadd.f32 %v816_v9, %v652_v26  ;;  %v881_v28 = vadd.f32 %v817_v39, %v653_v24  ;;  %v1334_v24 = vld [vmem:[%s3135_s3] sm:$0xff] }
 0x180   : > { %v1254_v50 = vadd.f32 %v1189_v51, %v3325_v61  ;;  %v1255_v25 = vadd.f32 %v1189_v51, %v3326_v58  ;;  %v1256_v54 = vadd.f32 %v1189_v51, %v3327_v7  ;;  %v1257_v40 = vadd.f32 %v1189_v51, %v3328_v18 }
 0x181   : > { %v1106_v56 = vadd.f32 %v1042_v10, %v878_v38  ;;  %v1107_v29 = vadd.f32 %v1043_v46, %v879_v1  ;;  %v1108_v57 = vadd.f32 %v1044_v6, %v880_v13  ;;  %v1109_v41 = vadd.f32 %v1045_v21, %v881_v28 }
 0x182   : > { %v1319_v5 = vmax.f32 %v1255_v25, 0.0  ;;  %v1321_v12 = vmax.f32 %v1257_v40, 0.0  ;;  %v1318_v8 = vmax.f32 %v1254_v50, 0.0  ;;  %v1320_v30 = vmax.f32 %v1256_v54, 0.0 }
 0x183   : > { %v1199_v37 = vpop.permute.xlu1 %1198 }
 0x184   : > { %v1262_v33 = vadd.f32 %v1199_v37, %v1102_v3  ;;  %v1263_v59 = vadd.f32 %v1199_v37, %v1103_v15  ;;  %v1264_v42 = vadd.f32 %v1199_v37, %v1104_v11  ;;  %v1265_v45 = vadd.f32 %v1199_v37, %v1105_v20 }
 0x185   : > { %v1762_v55 = vpack.c.bf16 %v1323_v27, %v1319_v5  ;;  %v1794_v23 = vpack.c.bf16 %v1325_v32, %v1321_v12  ;;  %v1764_v52 = vpack.c.bf16 %v1322_v36, %v1318_v8  ;;  %v1796_v34 = vpack.c.bf16 %v1324_v49, %v1320_v30  ;;  %v1339_v27 = vpop.permute.xlu0 %1338 }
 0x186   : > { %v1327_v62 = vmax.f32 %v1263_v59, 0.0  ;;  %v1329_v2 = vmax.f32 %v1265_v45, 0.0  ;;  %v1326_v43 = vmax.f32 %v1262_v33, 0.0  ;;  %v1328_v31 = vmax.f32 %v1264_v42, 0.0 }
 0x187   : > { %1763 = vmatprep.subr.bf16.mxu0 %v1762_v55  ;;  %1795 = vmatprep.subr.bf16.mxu1 %v1794_v23  ;;  %v1204_v47 = vpop.permute.xlu1 %1203 }
 0x188   : > { %v1266_v4 = vadd.f32 %v1204_v47, %v1106_v56  ;;  %v1267_v35 = vadd.f32 %v1204_v47, %v1107_v29  ;;  %v1268_v22 = vadd.f32 %v1204_v47, %v1108_v57  ;;  %v1269_v0 = vadd.f32 %v1204_v47, %v1109_v41  ;;  %1765 = vmatpush1.bf16.msra.mxu0 %v1764_v52 }
 0x189   : > { %1797 = vmatpush1.bf16.msra.mxu1 %v1796_v34 }
 0x18a   : > { %v1330_v60 = vmax.f32 %v1266_v4, 0.0  ;;  %v1331_v44 = vmax.f32 %v1267_v35, 0.0  ;;  %v1332_v16 = vmax.f32 %v1268_v22, 0.0  ;;  %v1333_v63 = vmax.f32 %v1269_v0, 0.0 }
 0x18c   : > { %v1766_v14 = vpack.c.bf16 %v1331_v44, %v1327_v62  ;;  %v1798_v53 = vpack.c.bf16 %v1333_v63, %v1329_v2  ;;  %v1768_v19 = vpack.c.bf16 %v1330_v60, %v1326_v43  ;;  %v1800_v26 = vpack.c.bf16 %v1332_v16, %v1328_v31 }
 0x18d   : > { %v1982_v43 = vmov 1966171168  }
 0x18e   : > { %1767 = vmatprep.subr.bf16.mxu0 %v1766_v14  ;;  %1799 = vmatprep.subr.bf16.mxu1 %v1798_v53  ;;  %v1574_v31 = vunpack.c.l.s4 %v1982_v43 }
 0x18f   : > { %1769 = vmatpush1.bf16.msra.mxu0 %v1768_v19  ;;  %1801 = vmatpush1.bf16.msra.mxu1 %v1800_v26  ;;  %v3329_v26 = vld [vmem:[#allocation7_spill] sm:$0xff] }
 0x190   : > { %v1575_v60 = vunpack.c.0.s8 %v1574_v31 }
 0x192   : > { %1406 = vmatmul.mubr.f32.vlgmr.msra.gmra.mrb[0].mxu0 %v1334_v24  ;;  %1477 = vmatmul.mubr.f32.vlgmr.msra.gmra.mrb[0].mxu1 %v1334_v24  ;;  %v1578_v24 = vsub.s32 %v1575_v60, %v3329_v26 }
 0x265   : > { %v1407_v32 = vpop.f32.mrb[0].mxu0  ;;  %v1478_v36 = vpop.f32.mrb[0].mxu1 }
 0x266   : > { %v1408_v49 = vadd.f32 %v1407_v32, %v1339_v27  ;;  %v1479_v3 = vadd.f32 %v1478_v36, %v1339_v27  ;;  %v1409_v15 = vpop.f32.mrb[1].mxu0  ;;  %v1480_v11 = vpop.f32.mrb[1].mxu1 }
 0x267   : > { %v1410_v20 = vadd.f32 %v1409_v15, %v1339_v27  ;;  %v1481_v48 = vadd.f32 %v1480_v11, %v1339_v27 }
 0x268   : > { %v1487_v17 = vrot.slane %v1408_v49, 1  ;;  %1559 = vst [vmem:[%s3073_s16] sm:$0xff] %v1408_v49  ;;  %v1489_v9 = vrot.slane %v1479_v3, 1  ;;  %1561 = vst [vmem:[%s3073_s16 + $0x10] sm:$0xff] %v1479_v3 }
 0x269   : > { %v1488_v39 = vrot.slane %v1410_v20, 1  ;;  %1560 = vst [vmem:[%s3073_s16 + $0x8] sm:$0xff] %v1410_v20  ;;  %v1490_v51 = vrot.slane %v1481_v48, 1  ;;  %1562 = vst [vmem:[%s3073_s16 + $0x18] sm:$0xff] %v1481_v48 }
 0x26a   : > { %v1495_v61 = vmax.f32 %v1408_v49, %v1487_v17  ;;  %v1497_v50 = vmax.f32 %v1479_v3, %v1489_v9 }
 0x26b   : > { %v1496_v58 = vmax.f32 %v1410_v20, %v1488_v39  ;;  %v1498_v25 = vmax.f32 %v1481_v48, %v1490_v51 }
 0x26c   : > { %v1499_v7 = vsub.f32 %v1408_v49, %v1495_v61  ;;  %v1515_v54 = vrot.slane %v1495_v61, 7  ;;  %v1501_v18 = vsub.f32 %v1479_v3, %v1497_v50  ;;  %v1517_v40 = vrot.slane %v1497_v50, 7 }
 0x26d   : > { %v1516_v10 = vrot.slane %v1496_v58, 7  ;;  %v1518_v46 = vrot.slane %v1498_v25, 7  ;;  %v1500_v12 = vsub.f32 %v1410_v20, %v1496_v58  ;;  %v1502_v28 = vsub.f32 %v1481_v48, %v1498_v25 }
 0x26e   : > { %v1503_v6 = vmul.f32 1.442695, %v1499_v7  ;;  %v1523_v21 = vsub.f32 %v1408_v49, %v1515_v54  ;;  %v1525_v5 = vsub.f32 %v1479_v3, %v1517_v40  ;;  %v1507_v38 = vmul.f32 1.442695, %v1501_v18 }
 0x26f   : > { %v1524_v8 = vsub.f32 %v1410_v20, %v1516_v10  ;;  %v1526_v30 = vsub.f32 %v1481_v48, %v1518_v46  ;;  %v1505_v33 = vmul.f32 1.442695, %v1500_v12  ;;  %v1509_v42 = vmul.f32 1.442695, %v1502_v28 }
 0x270   : > { %v1527_v37 = vmul.f32 1.442695, %v1523_v21  ;;  %v1531_v1 = vmul.f32 1.442695, %v1525_v5  ;;  %1889 = vpow2.f32 %v1503_v6  ;;  %v3330_v18 = vlaneseq }
 0x271   : > { %v1529_v13 = vmul.f32 1.442695, %v1524_v8  ;;  %v1533_v59 = vmul.f32 1.442695, %v1526_v30 }
 0x272   : > { %1891 = vpow2.f32 %v1527_v37  ;;  %vm1598_vm0 = vcmp.lt.s32.totalorder %v3330_v18, 512 }
 0x273   : > { %1893 = vpow2.f32 %v1531_v1 }
 0x274   : > { %1895 = vpow2.f32 %v1507_v38 }
 0x275   : > { %1897 = vpow2.f32 %v1529_v13 }
 0x276   : > { %1899 = vpow2.f32 %v1505_v33 }
 0x277   : > { %1901 = vpow2.f32 %v1533_v59 }
 0x278   : > { %1903 = vpow2.f32 %v1509_v42 }
 0x27a   : > { %v1890_v45 = vpop.eup %1889 }
 0x27c   : > { %v1892_v55 = vpop.eup %1891 }
 0x27d   : > { %v1894_v23 = vpop.eup %1893  ;;  %v1539_v52 = vrot.slane %v1892_v55, 1 }
 0x27e   : > { %v1896_v34 = vpop.eup %1895  ;;  %v1541_v56 = vrot.slane %v1894_v23, 1 }
 0x27f   : > { %v1898_v29 = vpop.eup %1897  ;;  %v1547_v57 = vadd.f32 %v1890_v45, %v1539_v52 }
 0x280   : > { %v1900_v41 = vpop.eup %1899  ;;  %v1549_v47 = vadd.f32 %v1896_v34, %v1541_v56  ;;  %v1540_v4 = vrot.slane %v1898_v29, 1 }
 0x281   : > { %v1902_v35 = vpop.eup %1901  ;;  %1905 = vrcp.f32 %v1547_v57 }
 0x282   : > { %1907 = vrcp.f32 %v1549_v47  ;;  %v1548_v22 = vadd.f32 %v1900_v41, %v1540_v4  ;;  %v1542_v0 = vrot.slane %v1902_v35, 1  ;;  %v1904_v62 = vpop.eup %1903 }
 0x284   : > { %1909 = vrcp.f32 %v1548_v22  ;;  %v1550_v2 = vadd.f32 %v1904_v62, %v1542_v0 }
 0x286   : > { %1911 = vrcp.f32 %v1550_v2 }
 0x28b   : > { %v1906_v44 = vpop.eup %1905 }
 0x28c   : > { %v1908_v16 = vpop.eup %1907  ;;  %v1606_v63 = vrot.slane %v1906_v44, 7  ;;  %v1563_v14 = vmul.f32 %v1906_v44, %v1890_v45 }
 0x28d   : > { %v1608_v53 = vrot.slane %v1908_v16, 7  ;;  %v1565_v32 = vmul.f32 %v1908_v16, %v1896_v34 }
 0x28e   : > { %v1910_v19 = vpop.eup %1909  ;;  %v1614_v27 = vmul.f32 %v1892_v55, %v1606_v63 }
 0x28f   : > { %v1564_v36 = vmul.f32 %v1910_v19, %v1900_v41  ;;  %v1607_v49 = vrot.slane %v1910_v19, 7  ;;  %v1616_v15 = vmul.f32 %v1894_v23, %v1608_v53 }
 0x290   : > { %v1912_v3 = vpop.eup %1911 }
 0x291   : > { %v1571_v11 = vcombine.low %v1563_v14, %v1564_v36  ;;  %v1615_v20 = vmul.f32 %v1898_v29, %v1607_v49  ;;  %v1566_v48 = vmul.f32 %v1912_v3, %v1904_v62  ;;  %v1609_v17 = vrot.slane %v1912_v3, 7 }
 0x293   : > { %v1579_v9 = vrot.slane %v1571_v11, %v1578_v24  ;;  %v1622_v39 = vcombine.low %v1614_v27, %v1615_v20  ;;  %v1572_v51 = vcombine.low %v1565_v32, %v1566_v48  ;;  %v1617_v61 = vmul.f32 %v1902_v35, %v1609_v17 }
 0x295   : > { %v1630_v50 = vrot.slane %v1622_v39, %v1578_v24  ;;  %v1586_v58 = vrot.slane %v1572_v51, %v1578_v24  ;;  %v1623_v25 = vcombine.low %v1616_v15, %v1617_v61 }
 0x297   : > { %v1587_v7 = vcombine.low %v1579_v9, %v1586_v58  ;;  %v1637_v54 = vrot.slane %v1623_v25, %v1578_v24 }
 0x299   : > { %v1594_v40 = vrot.slane %v1587_v7, %v1578_v24  ;;  %v1638_v10 = vcombine.high %v1630_v50, %v1637_v54 }
 0x29b   : > { %v1645_v46 = vrot.slane %v1638_v10, %v1578_v24  ;;  %1600 = vst.msk [vmem:[%s3073_s16] ss:$8 sm:$0xf] %vm1598_vm0, %v1594_v40 }
 0x29d   : > { %1731 = vst.msk [vmem:[%s3073_s16 + $0x1] ss:$8 sm:$0xf] %vm1598_vm0, %v1645_v46 }
 0x29e   : > { %1926 = shalt.err (!%p1923_p3)
}
 0x29f   : > { %s1927_s10 = scalar_lea.hbm %s3087_s30, 512  ;;  %s1931_s13 = scalar_lea.hbm %s3137_s5, 1024 }
 0x2a0   : > { %p1928_p4 = scmp.ne.s32.totalorder %s3087_s30, %s1927_s10  ;;  %p1932_p9 = scmp.lt.u32.totalorder %s3087_s30, %s3137_s5 }
 0x2a1   : > { %p1933_p10 = scmp.lt.u32.totalorder %s1931_s13, %s1927_s10  ;;  %p1935_p12 = scmp.lt.u32.totalorder %s1927_s10, %s3087_s30 }
 0x2a2   : > { %p1929_p7 = pnand %p1928_p4, %p2052_p5 }
 0x2a3   : > { %p1934_p11 = por %p1933_p10, %p1932_p9 }
 0x2a4   : > { %p1930_p8 = pneg %p1929_p7 }
 0x2a5   : > { %p1936_p13 = por %p1935_p12, %p1934_p11 }
 0x2a7   : > { %p1937_p0 = pnand %p1936_p13, %p1930_p8 }
 0x2a9   : > { %1940 = shalt.err (!%p1937_p0)
}
 0x2aa   : > { %1802 = dma.vmem_to_hbm [thread:$0]  (%p2052_p5), %s3089_s23, 512, %s3087_s30, %s1651_s6  }
 0x2ab PF: > { %p1808_p1 = scmp.ge.s32.totalorder %s1975_s21, 2  ;;  %s1677_s16 = sand.u32 1, %s1963_s18  }
 0x2ac   : > { %s1678_s17 = scalar_lea.sflag [#allocation3], %s1677_s16 }
 0x2ad   : > { %p1805_p2 = pnand %p1808_p1, %p2056_p6 }
 0x2af   : > { %1958 = dma.done.wait (!%p1805_p2), %s1678_s17, 512  }
 0x2b0   : > { %1960 = vsyncadd (!%p1805_p2), %s1678_s17, 4294966784  ;;  %p15_p3 = scmp.ge.s32.totalorder %s2039_s24, 4   ;;  %s3331_s18 = smov %s1967_s19 }
 0x2b1   : > { %s3332_s19 = smov %s1971_s20  ;;  %s3333_s20 = smov %s2050_s27 }
 0x2b2   : > { %s3334_s21 = smov %s2039_s24  ;;  %17 = sbr.rel (!%p15_p3) target bundleno = 3 (0x3), region = 76 }
 0x2b9   :  { %1683 = vsyncpa [#allocation3], 1 }
 0x2ba   :  { %1685 = vsyncpa [#allocation3 + $0x1], 1 }

</bundles_post_ra>
